<compile_context>
chip_gen: v6e
topology: v6e:2x2x1
jax: 0.10.0
libtpu: 0.0.40
codegen_flags: <defaults>
</compile_context>

<pallas_src>
import jax
import jax.numpy as jnp
import numpy as np
from jax.experimental import pallas as pl
from jax.experimental.pallas import tpu as pltpu

# ----- small, module-consistent sizes -----
VOCAB = 50
EMBED = 32      # embedding_dim
HIDDEN = 32     # hidden_dim
NUM_LAYERS = 2  # kernel unrolls exactly 2 layers, as in the module default
B = 2
T = 8
BPAD = 8        # batch padded to one sublane tile


# =============================== kernel ===============================

def text_encoder_kernel(x_ref, w_ref, head_ref, out_ref, pre_scr, h0_scr, h1_scr):
    H = HIDDEN
    Bp = BPAD

    # static row offsets inside the fused weight slab (all 8-row aligned)
    r_wih0 = 0
    r_whh0 = r_wih0 + EMBED
    r_wih1 = r_whh0 + 2 * H
    r_whh1 = r_wih1 + 2 * H
    r_b0 = r_whh1 + 2 * H
    r_b1 = r_b0 + 8

    # Fused gate lane layout (8H = 256 lanes): [i_f|i_b | f_f|f_b | o_f|o_b | g_f|g_b],
    # each block H lanes.  fwd columns are the first H of every 2H gate block.
    lane = jax.lax.broadcasted_iota(jnp.int32, (Bp, 8 * H), 1)
    fwd_mask = (lane % (2 * H)) < H          # hoisted once, reused by both layers

    def fused_bilstm(pre_ref, whh_bd, h_out_ref):
        """One layer: fwd+bwd recurrences fused into a single T-step serial loop.

        pre_ref:  (T*Bp, 8H) hoisted input projections (natural time order, row block t).
        whh_bd:   (2H, 8H) block-diagonal recurrent weights ([h_fwd|h_bwd] -> fused gates).
        h_out_ref:(T*Bp, 2H) output stream, row block t = [h_fwd(t) | h_bwd(t)].
        """
        h = jnp.zeros((Bp, 2 * H), jnp.float32)
        c = jnp.zeros((Bp, 2 * H), jnp.float32)
        for s in range(T):
            rs = T - 1 - s
            # fwd gates use the projection at time s, bwd gates the one at time T-1-s;
            # both reads are whole-vreg (8-aligned rows, full 256 lanes), merged by a select
            # that is off the h-dependency chain.
            pre = jnp.where(fwd_mask,
                            pre_ref[s * Bp:(s + 1) * Bp, :],
                            pre_ref[rs * Bp:(rs + 1) * Bp, :])
            g = pre + jnp.dot(h, whh_bd, preferred_element_type=jnp.float32)
            sg = jax.nn.sigmoid(g)               # i,f,o live in the first 6H lanes
            gg = jnp.tanh(g[:, 6 * H:])          # candidate gate, both directions (2H lanes)
            c = sg[:, 2 * H:4 * H] * c + sg[:, 0:2 * H] * gg
            h = sg[:, 4 * H:6 * H] * jnp.tanh(c)
            # stream to scratch: fwd half belongs to time s, bwd half to time T-1-s
            h_out_ref[s * Bp:(s + 1) * Bp, 0:H] = h[:, 0:H]
            h_out_ref[rs * Bp:(rs + 1) * Bp, H:2 * H] = h[:, H:2 * H]

    # ---- layer 0: hoisted input projection for both directions at once ----
    pre_scr[...] = (jnp.dot(x_ref[...], w_ref[r_wih0:r_wih0 + EMBED, :],
                            preferred_element_type=jnp.float32)
                    + w_ref[r_b0:r_b0 + 1, :])
    fused_bilstm(pre_scr, w_ref[r_whh0:r_whh0 + 2 * H, :], h0_scr)

    # ---- layer 1: projection straight from the layer-0 scratch stream ----
    pre_scr[...] = (jnp.dot(h0_scr[...], w_ref[r_wih1:r_wih1 + 2 * H, :],
                            preferred_element_type=jnp.float32)
                    + w_ref[r_b1:r_b1 + 1, :])
    fused_bilstm(pre_scr, w_ref[r_whh1:r_whh1 + 2 * H, :], h1_scr)

    # ---- output head: one batched matmul + ReLU, single store ----
    y = (jnp.dot(h1_scr[...], head_ref[0:2 * H, :],
                 preferred_element_type=jnp.float32)
         + head_ref[2 * H:2 * H + 1, :])
    out_ref[...] = jnp.maximum(y, 0.0)


def text_encoder_pallas(x_emb, packed_params):
    """x_emb: (B, T, E) float32 embedded tokens. Returns (B, T, HIDDEN) float32."""
    w_slab, head_slab = packed_params
    bsz, tlen, edim = x_emb.shape
    assert tlen == T and edim == EMBED and bsz <= BPAD

    # time-major + pad the batch to a full sublane tile (host-side layout plumbing)
    x_tm = jnp.swapaxes(x_emb, 0, 1)                                   # (T, B, E)
    x_tm = jnp.pad(x_tm, ((0, 0), (0, BPAD - bsz), (0, 0)))            # (T, Bp, E)
    x_flat = x_tm.reshape(tlen * BPAD, edim)                           # (T*Bp, E)

    vmem = pl.BlockSpec(memory_space=pltpu.MemorySpace.VMEM)
    y = pl.pallas_call(
        text_encoder_kernel,
        out_shape=jax.ShapeDtypeStruct((tlen * BPAD, HIDDEN), jnp.float32),
        in_specs=[vmem, vmem, vmem],
        out_specs=vmem,
        scratch_shapes=[
            pltpu.VMEM((tlen * BPAD, 8 * HIDDEN), jnp.float32),   # hoisted gate projections
            pltpu.VMEM((tlen * BPAD, 2 * HIDDEN), jnp.float32),   # layer-0 hidden stream
            pltpu.VMEM((tlen * BPAD, 2 * HIDDEN), jnp.float32),   # layer-1 hidden stream
        ],
    )(x_flat, w_slab, head_slab)

    y = y.reshape(tlen, BPAD, HIDDEN)[:, :bsz, :]                      # strip batch padding
    return jnp.swapaxes(y, 0, 1)                                       # (B, T, H)


# ===================== host-side parameter handling =====================

def init_raw_params(key):
    """Deterministic synthetic parameters in native PyTorch nn.LSTM / nn.Linear layouts."""
    k = 1.0 / np.sqrt(HIDDEN)
    keys = jax.random.split(key, 32)
    ki = iter(keys)

    def u(shape):
        return jax.random.uniform(next(ki), shape, jnp.float32, minval=-k, maxval=k)

    # embedding table ~ N(0, 1) like nn.Embedding default
    emb = jax.random.normal(next(ki), (VOCAB, EMBED), jnp.float32)

    raw = []
    for layer in range(NUM_LAYERS):
        in_dim = EMBED if layer == 0 else 2 * HIDDEN
        for _direction in range(2):  # forward, backward
            wih = u((4 * HIDDEN, in_dim))
            whh = u((4 * HIDDEN, HIDDEN))
            b_ih = u((1, 4 * HIDDEN))
            b_hh = u((1, 4 * HIDDEN))
            raw += [wih, whh, b_ih + b_hh]   # pre-sum the two biases
    wlin = u((HIDDEN, 2 * HIDDEN))           # nn.Linear(hidden*2, hidden): weight (out, in)
    blin = u((1, HIDDEN))
    raw += [wlin, blin]
    return emb, raw


def pack_params(raw):
    """Pre-transpose, gate-reorder, direction-fuse and slab-pack the PyTorch-layout params."""
    (wih0f, whh0f, b0f, wih0b, whh0b, b0b,
     wih1f, whh1f, b1f, wih1b, whh1b, b1b, wlin, blin) = raw
    H = HIDDEN
    # PyTorch gate row order: i=0, f=1, g=2, o=3.  Fused lane order: i, f, o, g (each [fwd|bwd]).
    GATES = (0, 1, 3, 2)

    def fuse_ih(wF, wB):                      # (4H, in) x2 -> (in, 8H)
        cols = []
        for gi in GATES:
            cols.append(wF[gi * H:(gi + 1) * H].T)
            cols.append(wB[gi * H:(gi + 1) * H].T)
        return jnp.concatenate(cols, axis=1)

    def fuse_hh_blockdiag(wF, wB):            # (4H, H) x2 -> block-diagonal (2H, 8H)
        z = jnp.zeros((H, H), jnp.float32)
        top, bot = [], []
        for gi in GATES:
            top += [wF[gi * H:(gi + 1) * H].T, z]
            bot += [z, wB[gi * H:(gi + 1) * H].T]
        return jnp.concatenate([jnp.concatenate(top, axis=1),
                                jnp.concatenate(bot, axis=1)], axis=0)

    def fuse_bias(bF, bB):                    # (1, 4H) x2 -> (1, 8H)
        cols = []
        for gi in GATES:
            cols.append(bF[:, gi * H:(gi + 1) * H])
            cols.append(bB[:, gi * H:(gi + 1) * H])
        return jnp.concatenate(cols, axis=1)

    def pad_rows(a, rows):
        return jnp.pad(a, ((0, rows - a.shape[0]), (0, 0)))

    # single lane-dense (240, 256) weight slab; every section starts at an 8-aligned row
    w_slab = jnp.concatenate([
        fuse_ih(wih0f, wih0b),                 # rows   0: 32  layer-0 W_ih (E, 8H)
        fuse_hh_blockdiag(whh0f, whh0b),       # rows  32: 96  layer-0 W_hh block-diag (2H, 8H)
        fuse_ih(wih1f, wih1b),                 # rows  96:160  layer-1 W_ih (2H, 8H)
        fuse_hh_blockdiag(whh1f, whh1b),       # rows 160:224  layer-1 W_hh block-diag
        pad_rows(fuse_bias(b0f, b0b), 8),      # rows 224:232  layer-0 bias (row 224)
        pad_rows(fuse_bias(b1f, b1b), 8),      # rows 232:240  layer-1 bias (row 232)
    ], axis=0)

    head_slab = jnp.concatenate([
        wlin.T,                                # rows  0:64  Linear weight (2H, H), [fwd; bwd]
        pad_rows(blin, 8),                     # rows 64:72  Linear bias (row 64)
    ], axis=0)
    return w_slab, head_slab


# =========================== plain-JAX reference ===========================

def _reference_forward(x, raw_params):
    """Straightforward port of PyTorch semantics (gate order i,f,g,o; no packing tricks)."""
    H = HIDDEN

    def lstm_dir(xs_list, wih, whh, bias, reverse):
        bsz = xs_list[0].shape[0]
        h = jnp.zeros((bsz, H), jnp.float32)
        c = jnp.zeros((bsz, H), jnp.float32)
        outs = [None] * len(xs_list)
        order = range(len(xs_list) - 1, -1, -1) if reverse else range(len(xs_list))
        for t in order:
            g = xs_list[t] @ wih.T + h @ whh.T + bias
            i_g = jax.nn.sigmoid(g[:, 0 * H:1 * H])
            f_g = jax.nn.sigmoid(g[:, 1 * H:2 * H])
            g_g = jnp.tanh(g[:, 2 * H:3 * H])
            o_g = jax.nn.sigmoid(g[:, 3 * H:4 * H])
            c = f_g * c + i_g * g_g
            h = o_g * jnp.tanh(c)
            outs[t] = h
        return outs

    (wih0f, whh0f, b0f, wih0b, whh0b, b0b,
     wih1f, whh1f, b1f, wih1b, whh1b, b1b, wlin, blin) = raw_params
    tlen = x.shape[1]
    xs = [x[:, t, :] for t in range(tlen)]
    f0 = lstm_dir(xs, wih0f, whh0f, b0f, False)
    r0 = lstm_dir(xs, wih0b, whh0b, b0b, True)
    l0 = [jnp.concatenate([f0[t], r0[t]], axis=-1) for t in range(tlen)]
    f1 = lstm_dir(l0, wih1f, whh1f, b1f, False)
    r1 = lstm_dir(l0, wih1b, whh1b, b1b, True)
    outs = []
    for t in range(tlen):
        ht = jnp.concatenate([f1[t], r1[t]], axis=-1)
        outs.append(jnp.maximum(ht @ wlin.T + blin, 0.0))
    return jnp.stack(outs, axis=1)                                      # (B, T, H)


# ================================= main =================================

if __name__ == "__main__":
    key = jax.random.PRNGKey(0)
    k_tok, k_par = jax.random.split(key)

    emb_table, raw_params = init_raw_params(k_par)
    packed_params = pack_params(raw_params)

    # token ids (B, T) int32
    tokens = jax.random.randint(k_tok, (B, T), 0, VOCAB, dtype=jnp.int32)

    # glue: embedding lookup (data-dependent gather) in plain JAX
    x_emb = jnp.take(emb_table, tokens, axis=0).astype(jnp.float32)     # (B, T, E)

    out = text_encoder_pallas(x_emb, packed_params)
    out = jax.block_until_ready(out)

    # reference: PyTorch-semantics math executed as plain JAX (unpacked params)
    ref = _reference_forward(x_emb, tuple(raw_params))
    ref = jax.block_until_ready(ref)

    assert out.shape == (B, T, HIDDEN), out.shape
    assert out.dtype == jnp.float32
    np.testing.assert_allclose(np.asarray(out), np.asarray(ref), rtol=1e-4, atol=1e-4)

    print("KERNEL_OK")
</pallas_src>

<mosaic_0001>
module attributes {stable_mosaic.version = 11 : i64} {
  func.func @text_encoder_kernel(%arg0: memref<64x32xf32, #tpu.memory_space<vmem>>, %arg1: memref<240x256xf32, #tpu.memory_space<vmem>>, %arg2: memref<72x32xf32, #tpu.memory_space<vmem>>, %arg3: memref<64x32xf32, #tpu.memory_space<vmem>>, %arg4: memref<64x256xf32, #tpu.memory_space<vmem>>, %arg5: memref<64x64xf32, #tpu.memory_space<vmem>>, %arg6: memref<64x64xf32, #tpu.memory_space<vmem>>) attributes {dimension_semantics = [], scalar_prefetch = 0 : i64, scratch_operands = 3 : i64, tpu.core_type = #tpu.core_type<tc>} {
    %0 = tpu.iota {dimensions = array<i32: 1>} : vector<8x256xi32>
    %c64_i32 = arith.constant 64 : i32
    %c0_i32 = arith.constant 0 : i32
    %1 = arith.cmpi eq, %c64_i32, %c0_i32 : i32
    %c1_i32 = arith.constant 1 : i32
    %2 = arith.select %1, %c1_i32, %c64_i32 : i32
    %3 = vector.broadcast %2 : i32 to vector<8x256xi32>
    %4 = arith.remsi %0, %3 : vector<8x256xi32>
    %c0_i32_0 = arith.constant 0 : i32
    %5 = vector.broadcast %c0_i32_0 : i32 to vector<8x256xi32>
    %6 = arith.cmpi ne, %4, %5 : vector<8x256xi32>
    %c0_i32_1 = arith.constant 0 : i32
    %7 = vector.broadcast %c0_i32_1 : i32 to vector<8x256xi32>
    %8 = arith.cmpi slt, %4, %7 : vector<8x256xi32>
    %c0_i32_2 = arith.constant 0 : i32
    %9 = arith.cmpi slt, %2, %c0_i32_2 : i32
    %10 = vector.broadcast %9 : i1 to vector<8x256xi1>
    %11 = vector.broadcast %10 : vector<8x256xi1> to vector<8x256xi1>
    %12 = arith.xori %8, %11 : vector<8x256xi1>
    %13 = arith.andi %12, %6 : vector<8x256xi1>
    %14 = vector.broadcast %2 : i32 to vector<8x256xi32>
    %15 = arith.addi %4, %14 : vector<8x256xi32>
    %16 = arith.select %13, %15, %4 : vector<8x256xi1>, vector<8x256xi32>
    %c32_i32 = arith.constant 32 : i32
    %17 = vector.broadcast %c32_i32 : i32 to vector<8x256xi32>
    %18 = arith.cmpi slt, %16, %17 : vector<8x256xi32>
    %c0 = arith.constant 0 : index
    %c0_3 = arith.constant 0 : index
    %19 = vector.load %arg0[%c0, %c0_3] : memref<64x32xf32, #tpu.memory_space<vmem>>, vector<64x32xf32>
    %c0_4 = arith.constant 0 : index
    %c0_5 = arith.constant 0 : index
    %20 = vector.load %arg1[%c0_4, %c0_5] : memref<240x256xf32, #tpu.memory_space<vmem>>, vector<32x256xf32>
    %cst = arith.constant dense<0.000000e+00> : vector<64x256xf32>
    %21 = tpu.matmul %19, %20, %cst {dimension_numbers = #tpu.dot_dimension_numbers<[1], [0], [0], [1], [0, 0, 1, 1], [], []>} : vector<64x32xf32>, vector<32x256xf32>, vector<64x256xf32> -> vector<64x256xf32>
    %c224 = arith.constant 224 : index
    %c0_6 = arith.constant 0 : index
    %22 = vector.load %arg1[%c224, %c0_6] : memref<240x256xf32, #tpu.memory_space<vmem>>, vector<1x256xf32>
    %23 = vector.broadcast %22 : vector<1x256xf32> to vector<64x256xf32>
    %24 = arith.addf %21, %23 : vector<64x256xf32>
    %c0_7 = arith.constant 0 : index
    %c0_8 = arith.constant 0 : index
    %25 = vector.load %arg4[%c0_7, %c0_8] : memref<64x256xf32, #tpu.memory_space<vmem>>, vector<64x256xf32>
    tpu.vector_store %arg4[%c0_7, %c0_8], %24 {strides = array<i32>} : memref<64x256xf32, #tpu.memory_space<vmem>>, vector<64x256xf32>,
    %c32 = arith.constant 32 : index
    %c0_9 = arith.constant 0 : index
    %26 = vector.load %arg1[%c32, %c0_9] : memref<240x256xf32, #tpu.memory_space<vmem>>, vector<64x256xf32>
    %cst_10 = arith.constant 0.000000e+00 : f32
    %27 = vector.broadcast %cst_10 : f32 to vector<8x64xf32>
    %cst_11 = arith.constant 0.000000e+00 : f32
    %28 = vector.broadcast %cst_11 : f32 to vector<8x64xf32>
    %c0_12 = arith.constant 0 : index
    %c0_13 = arith.constant 0 : index
    %29 = vector.load %arg4[%c0_12, %c0_13] : memref<64x256xf32, #tpu.memory_space<vmem>>, vector<8x256xf32>
    %c56 = arith.constant 56 : index
    %c0_14 = arith.constant 0 : index
    %30 = vector.load %arg4[%c56, %c0_14] : memref<64x256xf32, #tpu.memory_space<vmem>>, vector<8x256xf32>
    %31 = arith.select %18, %29, %30 : vector<8x256xi1>, vector<8x256xf32>
    %cst_15 = arith.constant dense<0.000000e+00> : vector<8x256xf32>
    %32 = tpu.matmul %27, %26, %cst_15 {dimension_numbers = #tpu.dot_dimension_numbers<[1], [0], [0], [1], [0, 0, 1, 1], [], []>} : vector<8x64xf32>, vector<64x256xf32>, vector<8x256xf32> -> vector<8x256xf32>
    %33 = arith.addf %31, %32 : vector<8x256xf32>
    %34 = arith.negf %33 : vector<8x256xf32>
    %35 = math.exp %34 : vector<8x256xf32>
    %cst_16 = arith.constant 1.000000e+00 : f32
    %36 = vector.broadcast %cst_16 : f32 to vector<8x256xf32>
    %37 = arith.addf %36, %35 : vector<8x256xf32>
    %38 = arith.divf %36, %37 : vector<8x256xf32>
    %39 = vector.extract_strided_slice %33 {offsets = [0, 192], sizes = [8, 64], strides = [1, 1]} : vector<8x256xf32> to vector<8x64xf32>
    %40 = math.tanh %39 : vector<8x64xf32>
    %41 = vector.extract_strided_slice %38 {offsets = [0, 64], sizes = [8, 64], strides = [1, 1]} : vector<8x256xf32> to vector<8x64xf32>
    %42 = arith.mulf %41, %28 : vector<8x64xf32>
    %43 = vector.extract_strided_slice %38 {offsets = [0, 0], sizes = [8, 64], strides = [1, 1]} : vector<8x256xf32> to vector<8x64xf32>
    %44 = arith.mulf %43, %40 : vector<8x64xf32>
    %45 = arith.addf %42, %44 : vector<8x64xf32>
    %46 = vector.extract_strided_slice %38 {offsets = [0, 128], sizes = [8, 64], strides = [1, 1]} : vector<8x256xf32> to vector<8x64xf32>
    %47 = math.tanh %45 : vector<8x64xf32>
    %48 = arith.mulf %46, %47 : vector<8x64xf32>
    %49 = vector.extract_strided_slice %48 {offsets = [0, 0], sizes = [8, 32], strides = [1, 1]} : vector<8x64xf32> to vector<8x32xf32>
    %c0_17 = arith.constant 0 : index
    %c0_18 = arith.constant 0 : index
    %50 = vector.load %arg5[%c0_17, %c0_18] : memref<64x64xf32, #tpu.memory_space<vmem>>, vector<8x32xf32>
    tpu.vector_store %arg5[%c0_17, %c0_18], %49 {strides = array<i32>} : memref<64x64xf32, #tpu.memory_space<vmem>>, vector<8x32xf32>,
    %51 = vector.extract_strided_slice %48 {offsets = [0, 32], sizes = [8, 32], strides = [1, 1]} : vector<8x64xf32> to vector<8x32xf32>
    %c56_19 = arith.constant 56 : index
    %c32_20 = arith.constant 32 : index
    %52 = vector.load %arg5[%c56_19, %c32_20] : memref<64x64xf32, #tpu.memory_space<vmem>>, vector<8x32xf32>
    tpu.vector_store %arg5[%c56_19, %c32_20], %51 {strides = array<i32>} : memref<64x64xf32, #tpu.memory_space<vmem>>, vector<8x32xf32>,
    %c8 = arith.constant 8 : index
    %c0_21 = arith.constant 0 : index
    %53 = vector.load %arg4[%c8, %c0_21] : memref<64x256xf32, #tpu.memory_space<vmem>>, vector<8x256xf32>
    %c48 = arith.constant 48 : index
    %c0_22 = arith.constant 0 : index
    %54 = vector.load %arg4[%c48, %c0_22] : memref<64x256xf32, #tpu.memory_space<vmem>>, vector<8x256xf32>
    %55 = arith.select %18, %53, %54 : vector<8x256xi1>, vector<8x256xf32>
    %cst_23 = arith.constant dense<0.000000e+00> : vector<8x256xf32>
    %56 = tpu.matmul %48, %26, %cst_23 {dimension_numbers = #tpu.dot_dimension_numbers<[1], [0], [0], [1], [0, 0, 1, 1], [], []>} : vector<8x64xf32>, vector<64x256xf32>, vector<8x256xf32> -> vector<8x256xf32>
    %57 = arith.addf %55, %56 : vector<8x256xf32>
    %58 = arith.negf %57 : vector<8x256xf32>
    %59 = math.exp %58 : vector<8x256xf32>
    %cst_24 = arith.constant 1.000000e+00 : f32
    %60 = vector.broadcast %cst_24 : f32 to vector<8x256xf32>
    %61 = arith.addf %60, %59 : vector<8x256xf32>
    %62 = arith.divf %60, %61 : vector<8x256xf32>
    %63 = vector.extract_strided_slice %57 {offsets = [0, 192], sizes = [8, 64], strides = [1, 1]} : vector<8x256xf32> to vector<8x64xf32>
    %64 = math.tanh %63 : vector<8x64xf32>
    %65 = vector.extract_strided_slice %62 {offsets = [0, 64], sizes = [8, 64], strides = [1, 1]} : vector<8x256xf32> to vector<8x64xf32>
    %66 = arith.mulf %65, %45 : vector<8x64xf32>
    %67 = vector.extract_strided_slice %62 {offsets = [0, 0], sizes = [8, 64], strides = [1, 1]} : vector<8x256xf32> to vector<8x64xf32>
    %68 = arith.mulf %67, %64 : vector<8x64xf32>
    %69 = arith.addf %66, %68 : vector<8x64xf32>
    %70 = vector.extract_strided_slice %62 {offsets = [0, 128], sizes = [8, 64], strides = [1, 1]} : vector<8x256xf32> to vector<8x64xf32>
    %71 = math.tanh %69 : vector<8x64xf32>
    %72 = arith.mulf %70, %71 : vector<8x64xf32>
    %73 = vector.extract_strided_slice %72 {offsets = [0, 0], sizes = [8, 32], strides = [1, 1]} : vector<8x64xf32> to vector<8x32xf32>
    %c8_25 = arith.constant 8 : index
    %c0_26 = arith.constant 0 : index
    %74 = vector.load %arg5[%c8_25, %c0_26] : memref<64x64xf32, #tpu.memory_space<vmem>>, vector<8x32xf32>
    tpu.vector_store %arg5[%c8_25, %c0_26], %73 {strides = array<i32>} : memref<64x64xf32, #tpu.memory_space<vmem>>, vector<8x32xf32>,
    %75 = vector.extract_strided_slice %72 {offsets = [0, 32], sizes = [8, 32], strides = [1, 1]} : vector<8x64xf32> to vector<8x32xf32>
    %c48_27 = arith.constant 48 : index
    %c32_28 = arith.constant 32 : index
    %76 = vector.load %arg5[%c48_27, %c32_28] : memref<64x64xf32, #tpu.memory_space<vmem>>, vector<8x32xf32>
    tpu.vector_store %arg5[%c48_27, %c32_28], %75 {strides = array<i32>} : memref<64x64xf32, #tpu.memory_space<vmem>>, vector<8x32xf32>,
    %c16 = arith.constant 16 : index
    %c0_29 = arith.constant 0 : index
    %77 = vector.load %arg4[%c16, %c0_29] : memref<64x256xf32, #tpu.memory_space<vmem>>, vector<8x256xf32>
    %c40 = arith.constant 40 : index
    %c0_30 = arith.constant 0 : index
    %78 = vector.load %arg4[%c40, %c0_30] : memref<64x256xf32, #tpu.memory_space<vmem>>, vector<8x256xf32>
    %79 = arith.select %18, %77, %78 : vector<8x256xi1>, vector<8x256xf32>
    %cst_31 = arith.constant dense<0.000000e+00> : vector<8x256xf32>
    %80 = tpu.matmul %72, %26, %cst_31 {dimension_numbers = #tpu.dot_dimension_numbers<[1], [0], [0], [1], [0, 0, 1, 1], [], []>} : vector<8x64xf32>, vector<64x256xf32>, vector<8x256xf32> -> vector<8x256xf32>
    %81 = arith.addf %79, %80 : vector<8x256xf32>
    %82 = arith.negf %81 : vector<8x256xf32>
    %83 = math.exp %82 : vector<8x256xf32>
    %cst_32 = arith.constant 1.000000e+00 : f32
    %84 = vector.broadcast %cst_32 : f32 to vector<8x256xf32>
    %85 = arith.addf %84, %83 : vector<8x256xf32>
    %86 = arith.divf %84, %85 : vector<8x256xf32>
    %87 = vector.extract_strided_slice %81 {offsets = [0, 192], sizes = [8, 64], strides = [1, 1]} : vector<8x256xf32> to vector<8x64xf32>
    %88 = math.tanh %87 : vector<8x64xf32>
    %89 = vector.extract_strided_slice %86 {offsets = [0, 64], sizes = [8, 64], strides = [1, 1]} : vector<8x256xf32> to vector<8x64xf32>
    %90 = arith.mulf %89, %69 : vector<8x64xf32>
    %91 = vector.extract_strided_slice %86 {offsets = [0, 0], sizes = [8, 64], strides = [1, 1]} : vector<8x256xf32> to vector<8x64xf32>
    %92 = arith.mulf %91, %88 : vector<8x64xf32>
    %93 = arith.addf %90, %92 : vector<8x64xf32>
    %94 = vector.extract_strided_slice %86 {offsets = [0, 128], sizes = [8, 64], strides = [1, 1]} : vector<8x256xf32> to vector<8x64xf32>
    %95 = math.tanh %93 : vector<8x64xf32>
    %96 = arith.mulf %94, %95 : vector<8x64xf32>
    %97 = vector.extract_strided_slice %96 {offsets = [0, 0], sizes = [8, 32], strides = [1, 1]} : vector<8x64xf32> to vector<8x32xf32>
    %c16_33 = arith.constant 16 : index
    %c0_34 = arith.constant 0 : index
    %98 = vector.load %arg5[%c16_33, %c0_34] : memref<64x64xf32, #tpu.memory_space<vmem>>, vector<8x32xf32>
    tpu.vector_store %arg5[%c16_33, %c0_34], %97 {strides = array<i32>} : memref<64x64xf32, #tpu.memory_space<vmem>>, vector<8x32xf32>,
    %99 = vector.extract_strided_slice %96 {offsets = [0, 32], sizes = [8, 32], strides = [1, 1]} : vector<8x64xf32> to vector<8x32xf32>
    %c40_35 = arith.constant 40 : index
    %c32_36 = arith.constant 32 : index
    %100 = vector.load %arg5[%c40_35, %c32_36] : memref<64x64xf32, #tpu.memory_space<vmem>>, vector<8x32xf32>
    tpu.vector_store %arg5[%c40_35, %c32_36], %99 {strides = array<i32>} : memref<64x64xf32, #tpu.memory_space<vmem>>, vector<8x32xf32>,
    %c24 = arith.constant 24 : index
    %c0_37 = arith.constant 0 : index
    %101 = vector.load %arg4[%c24, %c0_37] : memref<64x256xf32, #tpu.memory_space<vmem>>, vector<8x256xf32>
    %c32_38 = arith.constant 32 : index
    %c0_39 = arith.constant 0 : index
    %102 = vector.load %arg4[%c32_38, %c0_39] : memref<64x256xf32, #tpu.memory_space<vmem>>, vector<8x256xf32>
    %103 = arith.select %18, %101, %102 : vector<8x256xi1>, vector<8x256xf32>
    %cst_40 = arith.constant dense<0.000000e+00> : vector<8x256xf32>
    %104 = tpu.matmul %96, %26, %cst_40 {dimension_numbers = #tpu.dot_dimension_numbers<[1], [0], [0], [1], [0, 0, 1, 1], [], []>} : vector<8x64xf32>, vector<64x256xf32>, vector<8x256xf32> -> vector<8x256xf32>
    %105 = arith.addf %103, %104 : vector<8x256xf32>
    %106 = arith.negf %105 : vector<8x256xf32>
    %107 = math.exp %106 : vector<8x256xf32>
    %cst_41 = arith.constant 1.000000e+00 : f32
    %108 = vector.broadcast %cst_41 : f32 to vector<8x256xf32>
    %109 = arith.addf %108, %107 : vector<8x256xf32>
    %110 = arith.divf %108, %109 : vector<8x256xf32>
    %111 = vector.extract_strided_slice %105 {offsets = [0, 192], sizes = [8, 64], strides = [1, 1]} : vector<8x256xf32> to vector<8x64xf32>
    %112 = math.tanh %111 : vector<8x64xf32>
    %113 = vector.extract_strided_slice %110 {offsets = [0, 64], sizes = [8, 64], strides = [1, 1]} : vector<8x256xf32> to vector<8x64xf32>
    %114 = arith.mulf %113, %93 : vector<8x64xf32>
    %115 = vector.extract_strided_slice %110 {offsets = [0, 0], sizes = [8, 64], strides = [1, 1]} : vector<8x256xf32> to vector<8x64xf32>
    %116 = arith.mulf %115, %112 : vector<8x64xf32>
    %117 = arith.addf %114, %116 : vector<8x64xf32>
    %118 = vector.extract_strided_slice %110 {offsets = [0, 128], sizes = [8, 64], strides = [1, 1]} : vector<8x256xf32> to vector<8x64xf32>
    %119 = math.tanh %117 : vector<8x64xf32>
    %120 = arith.mulf %118, %119 : vector<8x64xf32>
    %121 = vector.extract_strided_slice %120 {offsets = [0, 0], sizes = [8, 32], strides = [1, 1]} : vector<8x64xf32> to vector<8x32xf32>
    %c24_42 = arith.constant 24 : index
    %c0_43 = arith.constant 0 : index
    %122 = vector.load %arg5[%c24_42, %c0_43] : memref<64x64xf32, #tpu.memory_space<vmem>>, vector<8x32xf32>
    tpu.vector_store %arg5[%c24_42, %c0_43], %121 {strides = array<i32>} : memref<64x64xf32, #tpu.memory_space<vmem>>, vector<8x32xf32>,
    %123 = vector.extract_strided_slice %120 {offsets = [0, 32], sizes = [8, 32], strides = [1, 1]} : vector<8x64xf32> to vector<8x32xf32>
    %c32_44 = arith.constant 32 : index
    %c32_45 = arith.constant 32 : index
    %124 = vector.load %arg5[%c32_44, %c32_45] : memref<64x64xf32, #tpu.memory_space<vmem>>, vector<8x32xf32>
    tpu.vector_store %arg5[%c32_44, %c32_45], %123 {strides = array<i32>} : memref<64x64xf32, #tpu.memory_space<vmem>>, vector<8x32xf32>,
    %c32_46 = arith.constant 32 : index
    %c0_47 = arith.constant 0 : index
    %125 = vector.load %arg4[%c32_46, %c0_47] : memref<64x256xf32, #tpu.memory_space<vmem>>, vector<8x256xf32>
    %c24_48 = arith.constant 24 : index
    %c0_49 = arith.constant 0 : index
    %126 = vector.load %arg4[%c24_48, %c0_49] : memref<64x256xf32, #tpu.memory_space<vmem>>, vector<8x256xf32>
    %127 = arith.select %18, %125, %126 : vector<8x256xi1>, vector<8x256xf32>
    %cst_50 = arith.constant dense<0.000000e+00> : vector<8x256xf32>
    %128 = tpu.matmul %120, %26, %cst_50 {dimension_numbers = #tpu.dot_dimension_numbers<[1], [0], [0], [1], [0, 0, 1, 1], [], []>} : vector<8x64xf32>, vector<64x256xf32>, vector<8x256xf32> -> vector<8x256xf32>
    %129 = arith.addf %127, %128 : vector<8x256xf32>
    %130 = arith.negf %129 : vector<8x256xf32>
    %131 = math.exp %130 : vector<8x256xf32>
    %cst_51 = arith.constant 1.000000e+00 : f32
    %132 = vector.broadcast %cst_51 : f32 to vector<8x256xf32>
    %133 = arith.addf %132, %131 : vector<8x256xf32>
    %134 = arith.divf %132, %133 : vector<8x256xf32>
    %135 = vector.extract_strided_slice %129 {offsets = [0, 192], sizes = [8, 64], strides = [1, 1]} : vector<8x256xf32> to vector<8x64xf32>
    %136 = math.tanh %135 : vector<8x64xf32>
    %137 = vector.extract_strided_slice %134 {offsets = [0, 64], sizes = [8, 64], strides = [1, 1]} : vector<8x256xf32> to vector<8x64xf32>
    %138 = arith.mulf %137, %117 : vector<8x64xf32>
    %139 = vector.extract_strided_slice %134 {offsets = [0, 0], sizes = [8, 64], strides = [1, 1]} : vector<8x256xf32> to vector<8x64xf32>
    %140 = arith.mulf %139, %136 : vector<8x64xf32>
    %141 = arith.addf %138, %140 : vector<8x64xf32>
    %142 = vector.extract_strided_slice %134 {offsets = [0, 128], sizes = [8, 64], strides = [1, 1]} : vector<8x256xf32> to vector<8x64xf32>
    %143 = math.tanh %141 : vector<8x64xf32>
    %144 = arith.mulf %142, %143 : vector<8x64xf32>
    %145 = vector.extract_strided_slice %144 {offsets = [0, 0], sizes = [8, 32], strides = [1, 1]} : vector<8x64xf32> to vector<8x32xf32>
    %c32_52 = arith.constant 32 : index
    %c0_53 = arith.constant 0 : index
    %146 = vector.load %arg5[%c32_52, %c0_53] : memref<64x64xf32, #tpu.memory_space<vmem>>, vector<8x32xf32>
    tpu.vector_store %arg5[%c32_52, %c0_53], %145 {strides = array<i32>} : memref<64x64xf32, #tpu.memory_space<vmem>>, vector<8x32xf32>,
    %147 = vector.extract_strided_slice %144 {offsets = [0, 32], sizes = [8, 32], strides = [1, 1]} : vector<8x64xf32> to vector<8x32xf32>
    %c24_54 = arith.constant 24 : index
    %c32_55 = arith.constant 32 : index
    %148 = vector.load %arg5[%c24_54, %c32_55] : memref<64x64xf32, #tpu.memory_space<vmem>>, vector<8x32xf32>
    tpu.vector_store %arg5[%c24_54, %c32_55], %147 {strides = array<i32>} : memref<64x64xf32, #tpu.memory_space<vmem>>, vector<8x32xf32>,
    %c40_56 = arith.constant 40 : index
    %c0_57 = arith.constant 0 : index
    %149 = vector.load %arg4[%c40_56, %c0_57] : memref<64x256xf32, #tpu.memory_space<vmem>>, vector<8x256xf32>
    %c16_58 = arith.constant 16 : index
    %c0_59 = arith.constant 0 : index
    %150 = vector.load %arg4[%c16_58, %c0_59] : memref<64x256xf32, #tpu.memory_space<vmem>>, vector<8x256xf32>
    %151 = arith.select %18, %149, %150 : vector<8x256xi1>, vector<8x256xf32>
    %cst_60 = arith.constant dense<0.000000e+00> : vector<8x256xf32>
    %152 = tpu.matmul %144, %26, %cst_60 {dimension_numbers = #tpu.dot_dimension_numbers<[1], [0], [0], [1], [0, 0, 1, 1], [], []>} : vector<8x64xf32>, vector<64x256xf32>, vector<8x256xf32> -> vector<8x256xf32>
    %153 = arith.addf %151, %152 : vector<8x256xf32>
    %154 = arith.negf %153 : vector<8x256xf32>
    %155 = math.exp %154 : vector<8x256xf32>
    %cst_61 = arith.constant 1.000000e+00 : f32
    %156 = vector.broadcast %cst_61 : f32 to vector<8x256xf32>
    %157 = arith.addf %156, %155 : vector<8x256xf32>
    %158 = arith.divf %156, %157 : vector<8x256xf32>
    %159 = vector.extract_strided_slice %153 {offsets = [0, 192], sizes = [8, 64], strides = [1, 1]} : vector<8x256xf32> to vector<8x64xf32>
    %160 = math.tanh %159 : vector<8x64xf32>
    %161 = vector.extract_strided_slice %158 {offsets = [0, 64], sizes = [8, 64], strides = [1, 1]} : vector<8x256xf32> to vector<8x64xf32>
    %162 = arith.mulf %161, %141 : vector<8x64xf32>
    %163 = vector.extract_strided_slice %158 {offsets = [0, 0], sizes = [8, 64], strides = [1, 1]} : vector<8x256xf32> to vector<8x64xf32>
    %164 = arith.mulf %163, %160 : vector<8x64xf32>
    %165 = arith.addf %162, %164 : vector<8x64xf32>
    %166 = vector.extract_strided_slice %158 {offsets = [0, 128], sizes = [8, 64], strides = [1, 1]} : vector<8x256xf32> to vector<8x64xf32>
    %167 = math.tanh %165 : vector<8x64xf32>
    %168 = arith.mulf %166, %167 : vector<8x64xf32>
    %169 = vector.extract_strided_slice %168 {offsets = [0, 0], sizes = [8, 32], strides = [1, 1]} : vector<8x64xf32> to vector<8x32xf32>
    %c40_62 = arith.constant 40 : index
    %c0_63 = arith.constant 0 : index
    %170 = vector.load %arg5[%c40_62, %c0_63] : memref<64x64xf32, #tpu.memory_space<vmem>>, vector<8x32xf32>
    tpu.vector_store %arg5[%c40_62, %c0_63], %169 {strides = array<i32>} : memref<64x64xf32, #tpu.memory_space<vmem>>, vector<8x32xf32>,
    %171 = vector.extract_strided_slice %168 {offsets = [0, 32], sizes = [8, 32], strides = [1, 1]} : vector<8x64xf32> to vector<8x32xf32>
    %c16_64 = arith.constant 16 : index
    %c32_65 = arith.constant 32 : index
    %172 = vector.load %arg5[%c16_64, %c32_65] : memref<64x64xf32, #tpu.memory_space<vmem>>, vector<8x32xf32>
    tpu.vector_store %arg5[%c16_64, %c32_65], %171 {strides = array<i32>} : memref<64x64xf32, #tpu.memory_space<vmem>>, vector<8x32xf32>,
    %c48_66 = arith.constant 48 : index
    %c0_67 = arith.constant 0 : index
    %173 = vector.load %arg4[%c48_66, %c0_67] : memref<64x256xf32, #tpu.memory_space<vmem>>, vector<8x256xf32>
    %c8_68 = arith.constant 8 : index
    %c0_69 = arith.constant 0 : index
    %174 = vector.load %arg4[%c8_68, %c0_69] : memref<64x256xf32, #tpu.memory_space<vmem>>, vector<8x256xf32>
    %175 = arith.select %18, %173, %174 : vector<8x256xi1>, vector<8x256xf32>
    %cst_70 = arith.constant dense<0.000000e+00> : vector<8x256xf32>
    %176 = tpu.matmul %168, %26, %cst_70 {dimension_numbers = #tpu.dot_dimension_numbers<[1], [0], [0], [1], [0, 0, 1, 1], [], []>} : vector<8x64xf32>, vector<64x256xf32>, vector<8x256xf32> -> vector<8x256xf32>
    %177 = arith.addf %175, %176 : vector<8x256xf32>
    %178 = arith.negf %177 : vector<8x256xf32>
    %179 = math.exp %178 : vector<8x256xf32>
    %cst_71 = arith.constant 1.000000e+00 : f32
    %180 = vector.broadcast %cst_71 : f32 to vector<8x256xf32>
    %181 = arith.addf %180, %179 : vector<8x256xf32>
    %182 = arith.divf %180, %181 : vector<8x256xf32>
    %183 = vector.extract_strided_slice %177 {offsets = [0, 192], sizes = [8, 64], strides = [1, 1]} : vector<8x256xf32> to vector<8x64xf32>
    %184 = math.tanh %183 : vector<8x64xf32>
    %185 = vector.extract_strided_slice %182 {offsets = [0, 64], sizes = [8, 64], strides = [1, 1]} : vector<8x256xf32> to vector<8x64xf32>
    %186 = arith.mulf %185, %165 : vector<8x64xf32>
    %187 = vector.extract_strided_slice %182 {offsets = [0, 0], sizes = [8, 64], strides = [1, 1]} : vector<8x256xf32> to vector<8x64xf32>
    %188 = arith.mulf %187, %184 : vector<8x64xf32>
    %189 = arith.addf %186, %188 : vector<8x64xf32>
    %190 = vector.extract_strided_slice %182 {offsets = [0, 128], sizes = [8, 64], strides = [1, 1]} : vector<8x256xf32> to vector<8x64xf32>
    %191 = math.tanh %189 : vector<8x64xf32>
    %192 = arith.mulf %190, %191 : vector<8x64xf32>
    %193 = vector.extract_strided_slice %192 {offsets = [0, 0], sizes = [8, 32], strides = [1, 1]} : vector<8x64xf32> to vector<8x32xf32>
    %c48_72 = arith.constant 48 : index
    %c0_73 = arith.constant 0 : index
    %194 = vector.load %arg5[%c48_72, %c0_73] : memref<64x64xf32, #tpu.memory_space<vmem>>, vector<8x32xf32>
    tpu.vector_store %arg5[%c48_72, %c0_73], %193 {strides = array<i32>} : memref<64x64xf32, #tpu.memory_space<vmem>>, vector<8x32xf32>,
    %195 = vector.extract_strided_slice %192 {offsets = [0, 32], sizes = [8, 32], strides = [1, 1]} : vector<8x64xf32> to vector<8x32xf32>
    %c8_74 = arith.constant 8 : index
    %c32_75 = arith.constant 32 : index
    %196 = vector.load %arg5[%c8_74, %c32_75] : memref<64x64xf32, #tpu.memory_space<vmem>>, vector<8x32xf32>
    tpu.vector_store %arg5[%c8_74, %c32_75], %195 {strides = array<i32>} : memref<64x64xf32, #tpu.memory_space<vmem>>, vector<8x32xf32>,
    %c56_76 = arith.constant 56 : index
    %c0_77 = arith.constant 0 : index
    %197 = vector.load %arg4[%c56_76, %c0_77] : memref<64x256xf32, #tpu.memory_space<vmem>>, vector<8x256xf32>
    %c0_78 = arith.constant 0 : index
    %c0_79 = arith.constant 0 : index
    %198 = vector.load %arg4[%c0_78, %c0_79] : memref<64x256xf32, #tpu.memory_space<vmem>>, vector<8x256xf32>
    %199 = arith.select %18, %197, %198 : vector<8x256xi1>, vector<8x256xf32>
    %cst_80 = arith.constant dense<0.000000e+00> : vector<8x256xf32>
    %200 = tpu.matmul %192, %26, %cst_80 {dimension_numbers = #tpu.dot_dimension_numbers<[1], [0], [0], [1], [0, 0, 1, 1], [], []>} : vector<8x64xf32>, vector<64x256xf32>, vector<8x256xf32> -> vector<8x256xf32>
    %201 = arith.addf %199, %200 : vector<8x256xf32>
    %202 = arith.negf %201 : vector<8x256xf32>
    %203 = math.exp %202 : vector<8x256xf32>
    %cst_81 = arith.constant 1.000000e+00 : f32
    %204 = vector.broadcast %cst_81 : f32 to vector<8x256xf32>
    %205 = arith.addf %204, %203 : vector<8x256xf32>
    %206 = arith.divf %204, %205 : vector<8x256xf32>
    %207 = vector.extract_strided_slice %201 {offsets = [0, 192], sizes = [8, 64], strides = [1, 1]} : vector<8x256xf32> to vector<8x64xf32>
    %208 = math.tanh %207 : vector<8x64xf32>
    %209 = vector.extract_strided_slice %206 {offsets = [0, 64], sizes = [8, 64], strides = [1, 1]} : vector<8x256xf32> to vector<8x64xf32>
    %210 = arith.mulf %209, %189 : vector<8x64xf32>
    %211 = vector.extract_strided_slice %206 {offsets = [0, 0], sizes = [8, 64], strides = [1, 1]} : vector<8x256xf32> to vector<8x64xf32>
    %212 = arith.mulf %211, %208 : vector<8x64xf32>
    %213 = arith.addf %210, %212 : vector<8x64xf32>
    %214 = vector.extract_strided_slice %206 {offsets = [0, 128], sizes = [8, 64], strides = [1, 1]} : vector<8x256xf32> to vector<8x64xf32>
    %215 = math.tanh %213 : vector<8x64xf32>
    %216 = arith.mulf %214, %215 : vector<8x64xf32>
    %217 = vector.extract_strided_slice %216 {offsets = [0, 0], sizes = [8, 32], strides = [1, 1]} : vector<8x64xf32> to vector<8x32xf32>
    %c56_82 = arith.constant 56 : index
    %c0_83 = arith.constant 0 : index
    %218 = vector.load %arg5[%c56_82, %c0_83] : memref<64x64xf32, #tpu.memory_space<vmem>>, vector<8x32xf32>
    tpu.vector_store %arg5[%c56_82, %c0_83], %217 {strides = array<i32>} : memref<64x64xf32, #tpu.memory_space<vmem>>, vector<8x32xf32>,
    %219 = vector.extract_strided_slice %216 {offsets = [0, 32], sizes = [8, 32], strides = [1, 1]} : vector<8x64xf32> to vector<8x32xf32>
    %c0_84 = arith.constant 0 : index
    %c32_85 = arith.constant 32 : index
    %220 = vector.load %arg5[%c0_84, %c32_85] : memref<64x64xf32, #tpu.memory_space<vmem>>, vector<8x32xf32>
    tpu.vector_store %arg5[%c0_84, %c32_85], %219 {strides = array<i32>} : memref<64x64xf32, #tpu.memory_space<vmem>>, vector<8x32xf32>,
    %c0_86 = arith.constant 0 : index
    %c0_87 = arith.constant 0 : index
    %221 = vector.load %arg5[%c0_86, %c0_87] : memref<64x64xf32, #tpu.memory_space<vmem>>, vector<64x64xf32>
    %c96 = arith.constant 96 : index
    %c0_88 = arith.constant 0 : index
    %222 = vector.load %arg1[%c96, %c0_88] : memref<240x256xf32, #tpu.memory_space<vmem>>, vector<64x256xf32>
    %cst_89 = arith.constant dense<0.000000e+00> : vector<64x256xf32>
    %223 = tpu.matmul %221, %222, %cst_89 {dimension_numbers = #tpu.dot_dimension_numbers<[1], [0], [0], [1], [0, 0, 1, 1], [], []>} : vector<64x64xf32>, vector<64x256xf32>, vector<64x256xf32> -> vector<64x256xf32>
    %c232 = arith.constant 232 : index
    %c0_90 = arith.constant 0 : index
    %224 = vector.load %arg1[%c232, %c0_90] : memref<240x256xf32, #tpu.memory_space<vmem>>, vector<1x256xf32>
    %225 = vector.broadcast %224 : vector<1x256xf32> to vector<64x256xf32>
    %226 = arith.addf %223, %225 : vector<64x256xf32>
    %c0_91 = arith.constant 0 : index
    %c0_92 = arith.constant 0 : index
    %227 = vector.load %arg4[%c0_91, %c0_92] : memref<64x256xf32, #tpu.memory_space<vmem>>, vector<64x256xf32>
    tpu.vector_store %arg4[%c0_91, %c0_92], %226 {strides = array<i32>} : memref<64x256xf32, #tpu.memory_space<vmem>>, vector<64x256xf32>,
    %c160 = arith.constant 160 : index
    %c0_93 = arith.constant 0 : index
    %228 = vector.load %arg1[%c160, %c0_93] : memref<240x256xf32, #tpu.memory_space<vmem>>, vector<64x256xf32>
    %cst_94 = arith.constant 0.000000e+00 : f32
    %229 = vector.broadcast %cst_94 : f32 to vector<8x64xf32>
    %cst_95 = arith.constant 0.000000e+00 : f32
    %230 = vector.broadcast %cst_95 : f32 to vector<8x64xf32>
    %c0_96 = arith.constant 0 : index
    %c0_97 = arith.constant 0 : index
    %231 = vector.load %arg4[%c0_96, %c0_97] : memref<64x256xf32, #tpu.memory_space<vmem>>, vector<8x256xf32>
    %c56_98 = arith.constant 56 : index
    %c0_99 = arith.constant 0 : index
    %232 = vector.load %arg4[%c56_98, %c0_99] : memref<64x256xf32, #tpu.memory_space<vmem>>, vector<8x256xf32>
    %233 = arith.select %18, %231, %232 : vector<8x256xi1>, vector<8x256xf32>
    %cst_100 = arith.constant dense<0.000000e+00> : vector<8x256xf32>
    %234 = tpu.matmul %229, %228, %cst_100 {dimension_numbers = #tpu.dot_dimension_numbers<[1], [0], [0], [1], [0, 0, 1, 1], [], []>} : vector<8x64xf32>, vector<64x256xf32>, vector<8x256xf32> -> vector<8x256xf32>
    %235 = arith.addf %233, %234 : vector<8x256xf32>
    %236 = arith.negf %235 : vector<8x256xf32>
    %237 = math.exp %236 : vector<8x256xf32>
    %cst_101 = arith.constant 1.000000e+00 : f32
    %238 = vector.broadcast %cst_101 : f32 to vector<8x256xf32>
    %239 = arith.addf %238, %237 : vector<8x256xf32>
    %240 = arith.divf %238, %239 : vector<8x256xf32>
    %241 = vector.extract_strided_slice %235 {offsets = [0, 192], sizes = [8, 64], strides = [1, 1]} : vector<8x256xf32> to vector<8x64xf32>
    %242 = math.tanh %241 : vector<8x64xf32>
    %243 = vector.extract_strided_slice %240 {offsets = [0, 64], sizes = [8, 64], strides = [1, 1]} : vector<8x256xf32> to vector<8x64xf32>
    %244 = arith.mulf %243, %230 : vector<8x64xf32>
    %245 = vector.extract_strided_slice %240 {offsets = [0, 0], sizes = [8, 64], strides = [1, 1]} : vector<8x256xf32> to vector<8x64xf32>
    %246 = arith.mulf %245, %242 : vector<8x64xf32>
    %247 = arith.addf %244, %246 : vector<8x64xf32>
    %248 = vector.extract_strided_slice %240 {offsets = [0, 128], sizes = [8, 64], strides = [1, 1]} : vector<8x256xf32> to vector<8x64xf32>
    %249 = math.tanh %247 : vector<8x64xf32>
    %250 = arith.mulf %248, %249 : vector<8x64xf32>
    %251 = vector.extract_strided_slice %250 {offsets = [0, 0], sizes = [8, 32], strides = [1, 1]} : vector<8x64xf32> to vector<8x32xf32>
    %c0_102 = arith.constant 0 : index
    %c0_103 = arith.constant 0 : index
    %252 = vector.load %arg6[%c0_102, %c0_103] : memref<64x64xf32, #tpu.memory_space<vmem>>, vector<8x32xf32>
    tpu.vector_store %arg6[%c0_102, %c0_103], %251 {strides = array<i32>} : memref<64x64xf32, #tpu.memory_space<vmem>>, vector<8x32xf32>,
    %253 = vector.extract_strided_slice %250 {offsets = [0, 32], sizes = [8, 32], strides = [1, 1]} : vector<8x64xf32> to vector<8x32xf32>
    %c56_104 = arith.constant 56 : index
    %c32_105 = arith.constant 32 : index
    %254 = vector.load %arg6[%c56_104, %c32_105] : memref<64x64xf32, #tpu.memory_space<vmem>>, vector<8x32xf32>
    tpu.vector_store %arg6[%c56_104, %c32_105], %253 {strides = array<i32>} : memref<64x64xf32, #tpu.memory_space<vmem>>, vector<8x32xf32>,
    %c8_106 = arith.constant 8 : index
    %c0_107 = arith.constant 0 : index
    %255 = vector.load %arg4[%c8_106, %c0_107] : memref<64x256xf32, #tpu.memory_space<vmem>>, vector<8x256xf32>
    %c48_108 = arith.constant 48 : index
    %c0_109 = arith.constant 0 : index
    %256 = vector.load %arg4[%c48_108, %c0_109] : memref<64x256xf32, #tpu.memory_space<vmem>>, vector<8x256xf32>
    %257 = arith.select %18, %255, %256 : vector<8x256xi1>, vector<8x256xf32>
    %cst_110 = arith.constant dense<0.000000e+00> : vector<8x256xf32>
    %258 = tpu.matmul %250, %228, %cst_110 {dimension_numbers = #tpu.dot_dimension_numbers<[1], [0], [0], [1], [0, 0, 1, 1], [], []>} : vector<8x64xf32>, vector<64x256xf32>, vector<8x256xf32> -> vector<8x256xf32>
    %259 = arith.addf %257, %258 : vector<8x256xf32>
    %260 = arith.negf %259 : vector<8x256xf32>
    %261 = math.exp %260 : vector<8x256xf32>
    %cst_111 = arith.constant 1.000000e+00 : f32
    %262 = vector.broadcast %cst_111 : f32 to vector<8x256xf32>
    %263 = arith.addf %262, %261 : vector<8x256xf32>
    %264 = arith.divf %262, %263 : vector<8x256xf32>
    %265 = vector.extract_strided_slice %259 {offsets = [0, 192], sizes = [8, 64], strides = [1, 1]} : vector<8x256xf32> to vector<8x64xf32>
    %266 = math.tanh %265 : vector<8x64xf32>
    %267 = vector.extract_strided_slice %264 {offsets = [0, 64], sizes = [8, 64], strides = [1, 1]} : vector<8x256xf32> to vector<8x64xf32>
    %268 = arith.mulf %267, %247 : vector<8x64xf32>
    %269 = vector.extract_strided_slice %264 {offsets = [0, 0], sizes = [8, 64], strides = [1, 1]} : vector<8x256xf32> to vector<8x64xf32>
    %270 = arith.mulf %269, %266 : vector<8x64xf32>
    %271 = arith.addf %268, %270 : vector<8x64xf32>
    %272 = vector.extract_strided_slice %264 {offsets = [0, 128], sizes = [8, 64], strides = [1, 1]} : vector<8x256xf32> to vector<8x64xf32>
    %273 = math.tanh %271 : vector<8x64xf32>
    %274 = arith.mulf %272, %273 : vector<8x64xf32>
    %275 = vector.extract_strided_slice %274 {offsets = [0, 0], sizes = [8, 32], strides = [1, 1]} : vector<8x64xf32> to vector<8x32xf32>
    %c8_112 = arith.constant 8 : index
    %c0_113 = arith.constant 0 : index
    %276 = vector.load %arg6[%c8_112, %c0_113] : memref<64x64xf32, #tpu.memory_space<vmem>>, vector<8x32xf32>
    tpu.vector_store %arg6[%c8_112, %c0_113], %275 {strides = array<i32>} : memref<64x64xf32, #tpu.memory_space<vmem>>, vector<8x32xf32>,
    %277 = vector.extract_strided_slice %274 {offsets = [0, 32], sizes = [8, 32], strides = [1, 1]} : vector<8x64xf32> to vector<8x32xf32>
    %c48_114 = arith.constant 48 : index
    %c32_115 = arith.constant 32 : index
    %278 = vector.load %arg6[%c48_114, %c32_115] : memref<64x64xf32, #tpu.memory_space<vmem>>, vector<8x32xf32>
    tpu.vector_store %arg6[%c48_114, %c32_115], %277 {strides = array<i32>} : memref<64x64xf32, #tpu.memory_space<vmem>>, vector<8x32xf32>,
    %c16_116 = arith.constant 16 : index
    %c0_117 = arith.constant 0 : index
    %279 = vector.load %arg4[%c16_116, %c0_117] : memref<64x256xf32, #tpu.memory_space<vmem>>, vector<8x256xf32>
    %c40_118 = arith.constant 40 : index
    %c0_119 = arith.constant 0 : index
    %280 = vector.load %arg4[%c40_118, %c0_119] : memref<64x256xf32, #tpu.memory_space<vmem>>, vector<8x256xf32>
    %281 = arith.select %18, %279, %280 : vector<8x256xi1>, vector<8x256xf32>
    %cst_120 = arith.constant dense<0.000000e+00> : vector<8x256xf32>
    %282 = tpu.matmul %274, %228, %cst_120 {dimension_numbers = #tpu.dot_dimension_numbers<[1], [0], [0], [1], [0, 0, 1, 1], [], []>} : vector<8x64xf32>, vector<64x256xf32>, vector<8x256xf32> -> vector<8x256xf32>
    %283 = arith.addf %281, %282 : vector<8x256xf32>
    %284 = arith.negf %283 : vector<8x256xf32>
    %285 = math.exp %284 : vector<8x256xf32>
    %cst_121 = arith.constant 1.000000e+00 : f32
    %286 = vector.broadcast %cst_121 : f32 to vector<8x256xf32>
    %287 = arith.addf %286, %285 : vector<8x256xf32>
    %288 = arith.divf %286, %287 : vector<8x256xf32>
    %289 = vector.extract_strided_slice %283 {offsets = [0, 192], sizes = [8, 64], strides = [1, 1]} : vector<8x256xf32> to vector<8x64xf32>
    %290 = math.tanh %289 : vector<8x64xf32>
    %291 = vector.extract_strided_slice %288 {offsets = [0, 64], sizes = [8, 64], strides = [1, 1]} : vector<8x256xf32> to vector<8x64xf32>
    %292 = arith.mulf %291, %271 : vector<8x64xf32>
    %293 = vector.extract_strided_slice %288 {offsets = [0, 0], sizes = [8, 64], strides = [1, 1]} : vector<8x256xf32> to vector<8x64xf32>
    %294 = arith.mulf %293, %290 : vector<8x64xf32>
    %295 = arith.addf %292, %294 : vector<8x64xf32>
    %296 = vector.extract_strided_slice %288 {offsets = [0, 128], sizes = [8, 64], strides = [1, 1]} : vector<8x256xf32> to vector<8x64xf32>
    %297 = math.tanh %295 : vector<8x64xf32>
    %298 = arith.mulf %296, %297 : vector<8x64xf32>
    %299 = vector.extract_strided_slice %298 {offsets = [0, 0], sizes = [8, 32], strides = [1, 1]} : vector<8x64xf32> to vector<8x32xf32>
    %c16_122 = arith.constant 16 : index
    %c0_123 = arith.constant 0 : index
    %300 = vector.load %arg6[%c16_122, %c0_123] : memref<64x64xf32, #tpu.memory_space<vmem>>, vector<8x32xf32>
    tpu.vector_store %arg6[%c16_122, %c0_123], %299 {strides = array<i32>} : memref<64x64xf32, #tpu.memory_space<vmem>>, vector<8x32xf32>,
    %301 = vector.extract_strided_slice %298 {offsets = [0, 32], sizes = [8, 32], strides = [1, 1]} : vector<8x64xf32> to vector<8x32xf32>
    %c40_124 = arith.constant 40 : index
    %c32_125 = arith.constant 32 : index
    %302 = vector.load %arg6[%c40_124, %c32_125] : memref<64x64xf32, #tpu.memory_space<vmem>>, vector<8x32xf32>
    tpu.vector_store %arg6[%c40_124, %c32_125], %301 {strides = array<i32>} : memref<64x64xf32, #tpu.memory_space<vmem>>, vector<8x32xf32>,
    %c24_126 = arith.constant 24 : index
    %c0_127 = arith.constant 0 : index
    %303 = vector.load %arg4[%c24_126, %c0_127] : memref<64x256xf32, #tpu.memory_space<vmem>>, vector<8x256xf32>
    %c32_128 = arith.constant 32 : index
    %c0_129 = arith.constant 0 : index
    %304 = vector.load %arg4[%c32_128, %c0_129] : memref<64x256xf32, #tpu.memory_space<vmem>>, vector<8x256xf32>
    %305 = arith.select %18, %303, %304 : vector<8x256xi1>, vector<8x256xf32>
    %cst_130 = arith.constant dense<0.000000e+00> : vector<8x256xf32>
    %306 = tpu.matmul %298, %228, %cst_130 {dimension_numbers = #tpu.dot_dimension_numbers<[1], [0], [0], [1], [0, 0, 1, 1], [], []>} : vector<8x64xf32>, vector<64x256xf32>, vector<8x256xf32> -> vector<8x256xf32>
    %307 = arith.addf %305, %306 : vector<8x256xf32>
    %308 = arith.negf %307 : vector<8x256xf32>
    %309 = math.exp %308 : vector<8x256xf32>
    %cst_131 = arith.constant 1.000000e+00 : f32
    %310 = vector.broadcast %cst_131 : f32 to vector<8x256xf32>
    %311 = arith.addf %310, %309 : vector<8x256xf32>
    %312 = arith.divf %310, %311 : vector<8x256xf32>
    %313 = vector.extract_strided_slice %307 {offsets = [0, 192], sizes = [8, 64], strides = [1, 1]} : vector<8x256xf32> to vector<8x64xf32>
    %314 = math.tanh %313 : vector<8x64xf32>
    %315 = vector.extract_strided_slice %312 {offsets = [0, 64], sizes = [8, 64], strides = [1, 1]} : vector<8x256xf32> to vector<8x64xf32>
    %316 = arith.mulf %315, %295 : vector<8x64xf32>
    %317 = vector.extract_strided_slice %312 {offsets = [0, 0], sizes = [8, 64], strides = [1, 1]} : vector<8x256xf32> to vector<8x64xf32>
    %318 = arith.mulf %317, %314 : vector<8x64xf32>
    %319 = arith.addf %316, %318 : vector<8x64xf32>
    %320 = vector.extract_strided_slice %312 {offsets = [0, 128], sizes = [8, 64], strides = [1, 1]} : vector<8x256xf32> to vector<8x64xf32>
    %321 = math.tanh %319 : vector<8x64xf32>
    %322 = arith.mulf %320, %321 : vector<8x64xf32>
    %323 = vector.extract_strided_slice %322 {offsets = [0, 0], sizes = [8, 32], strides = [1, 1]} : vector<8x64xf32> to vector<8x32xf32>
    %c24_132 = arith.constant 24 : index
    %c0_133 = arith.constant 0 : index
    %324 = vector.load %arg6[%c24_132, %c0_133] : memref<64x64xf32, #tpu.memory_space<vmem>>, vector<8x32xf32>
    tpu.vector_store %arg6[%c24_132, %c0_133], %323 {strides = array<i32>} : memref<64x64xf32, #tpu.memory_space<vmem>>, vector<8x32xf32>,
    %325 = vector.extract_strided_slice %322 {offsets = [0, 32], sizes = [8, 32], strides = [1, 1]} : vector<8x64xf32> to vector<8x32xf32>
    %c32_134 = arith.constant 32 : index
    %c32_135 = arith.constant 32 : index
    %326 = vector.load %arg6[%c32_134, %c32_135] : memref<64x64xf32, #tpu.memory_space<vmem>>, vector<8x32xf32>
    tpu.vector_store %arg6[%c32_134, %c32_135], %325 {strides = array<i32>} : memref<64x64xf32, #tpu.memory_space<vmem>>, vector<8x32xf32>,
    %c32_136 = arith.constant 32 : index
    %c0_137 = arith.constant 0 : index
    %327 = vector.load %arg4[%c32_136, %c0_137] : memref<64x256xf32, #tpu.memory_space<vmem>>, vector<8x256xf32>
    %c24_138 = arith.constant 24 : index
    %c0_139 = arith.constant 0 : index
    %328 = vector.load %arg4[%c24_138, %c0_139] : memref<64x256xf32, #tpu.memory_space<vmem>>, vector<8x256xf32>
    %329 = arith.select %18, %327, %328 : vector<8x256xi1>, vector<8x256xf32>
    %cst_140 = arith.constant dense<0.000000e+00> : vector<8x256xf32>
    %330 = tpu.matmul %322, %228, %cst_140 {dimension_numbers = #tpu.dot_dimension_numbers<[1], [0], [0], [1], [0, 0, 1, 1], [], []>} : vector<8x64xf32>, vector<64x256xf32>, vector<8x256xf32> -> vector<8x256xf32>
    %331 = arith.addf %329, %330 : vector<8x256xf32>
    %332 = arith.negf %331 : vector<8x256xf32>
    %333 = math.exp %332 : vector<8x256xf32>
    %cst_141 = arith.constant 1.000000e+00 : f32
    %334 = vector.broadcast %cst_141 : f32 to vector<8x256xf32>
    %335 = arith.addf %334, %333 : vector<8x256xf32>
    %336 = arith.divf %334, %335 : vector<8x256xf32>
    %337 = vector.extract_strided_slice %331 {offsets = [0, 192], sizes = [8, 64], strides = [1, 1]} : vector<8x256xf32> to vector<8x64xf32>
    %338 = math.tanh %337 : vector<8x64xf32>
    %339 = vector.extract_strided_slice %336 {offsets = [0, 64], sizes = [8, 64], strides = [1, 1]} : vector<8x256xf32> to vector<8x64xf32>
    %340 = arith.mulf %339, %319 : vector<8x64xf32>
    %341 = vector.extract_strided_slice %336 {offsets = [0, 0], sizes = [8, 64], strides = [1, 1]} : vector<8x256xf32> to vector<8x64xf32>
    %342 = arith.mulf %341, %338 : vector<8x64xf32>
    %343 = arith.addf %340, %342 : vector<8x64xf32>
    %344 = vector.extract_strided_slice %336 {offsets = [0, 128], sizes = [8, 64], strides = [1, 1]} : vector<8x256xf32> to vector<8x64xf32>
    %345 = math.tanh %343 : vector<8x64xf32>
    %346 = arith.mulf %344, %345 : vector<8x64xf32>
    %347 = vector.extract_strided_slice %346 {offsets = [0, 0], sizes = [8, 32], strides = [1, 1]} : vector<8x64xf32> to vector<8x32xf32>
    %c32_142 = arith.constant 32 : index
    %c0_143 = arith.constant 0 : index
    %348 = vector.load %arg6[%c32_142, %c0_143] : memref<64x64xf32, #tpu.memory_space<vmem>>, vector<8x32xf32>
    tpu.vector_store %arg6[%c32_142, %c0_143], %347 {strides = array<i32>} : memref<64x64xf32, #tpu.memory_space<vmem>>, vector<8x32xf32>,
    %349 = vector.extract_strided_slice %346 {offsets = [0, 32], sizes = [8, 32], strides = [1, 1]} : vector<8x64xf32> to vector<8x32xf32>
    %c24_144 = arith.constant 24 : index
    %c32_145 = arith.constant 32 : index
    %350 = vector.load %arg6[%c24_144, %c32_145] : memref<64x64xf32, #tpu.memory_space<vmem>>, vector<8x32xf32>
    tpu.vector_store %arg6[%c24_144, %c32_145], %349 {strides = array<i32>} : memref<64x64xf32, #tpu.memory_space<vmem>>, vector<8x32xf32>,
    %c40_146 = arith.constant 40 : index
    %c0_147 = arith.constant 0 : index
    %351 = vector.load %arg4[%c40_146, %c0_147] : memref<64x256xf32, #tpu.memory_space<vmem>>, vector<8x256xf32>
    %c16_148 = arith.constant 16 : index
    %c0_149 = arith.constant 0 : index
    %352 = vector.load %arg4[%c16_148, %c0_149] : memref<64x256xf32, #tpu.memory_space<vmem>>, vector<8x256xf32>
    %353 = arith.select %18, %351, %352 : vector<8x256xi1>, vector<8x256xf32>
    %cst_150 = arith.constant dense<0.000000e+00> : vector<8x256xf32>
    %354 = tpu.matmul %346, %228, %cst_150 {dimension_numbers = #tpu.dot_dimension_numbers<[1], [0], [0], [1], [0, 0, 1, 1], [], []>} : vector<8x64xf32>, vector<64x256xf32>, vector<8x256xf32> -> vector<8x256xf32>
    %355 = arith.addf %353, %354 : vector<8x256xf32>
    %356 = arith.negf %355 : vector<8x256xf32>
    %357 = math.exp %356 : vector<8x256xf32>
    %cst_151 = arith.constant 1.000000e+00 : f32
    %358 = vector.broadcast %cst_151 : f32 to vector<8x256xf32>
    %359 = arith.addf %358, %357 : vector<8x256xf32>
    %360 = arith.divf %358, %359 : vector<8x256xf32>
    %361 = vector.extract_strided_slice %355 {offsets = [0, 192], sizes = [8, 64], strides = [1, 1]} : vector<8x256xf32> to vector<8x64xf32>
    %362 = math.tanh %361 : vector<8x64xf32>
    %363 = vector.extract_strided_slice %360 {offsets = [0, 64], sizes = [8, 64], strides = [1, 1]} : vector<8x256xf32> to vector<8x64xf32>
    %364 = arith.mulf %363, %343 : vector<8x64xf32>
    %365 = vector.extract_strided_slice %360 {offsets = [0, 0], sizes = [8, 64], strides = [1, 1]} : vector<8x256xf32> to vector<8x64xf32>
    %366 = arith.mulf %365, %362 : vector<8x64xf32>
    %367 = arith.addf %364, %366 : vector<8x64xf32>
    %368 = vector.extract_strided_slice %360 {offsets = [0, 128], sizes = [8, 64], strides = [1, 1]} : vector<8x256xf32> to vector<8x64xf32>
    %369 = math.tanh %367 : vector<8x64xf32>
    %370 = arith.mulf %368, %369 : vector<8x64xf32>
    %371 = vector.extract_strided_slice %370 {offsets = [0, 0], sizes = [8, 32], strides = [1, 1]} : vector<8x64xf32> to vector<8x32xf32>
    %c40_152 = arith.constant 40 : index
    %c0_153 = arith.constant 0 : index
    %372 = vector.load %arg6[%c40_152, %c0_153] : memref<64x64xf32, #tpu.memory_space<vmem>>, vector<8x32xf32>
    tpu.vector_store %arg6[%c40_152, %c0_153], %371 {strides = array<i32>} : memref<64x64xf32, #tpu.memory_space<vmem>>, vector<8x32xf32>,
    %373 = vector.extract_strided_slice %370 {offsets = [0, 32], sizes = [8, 32], strides = [1, 1]} : vector<8x64xf32> to vector<8x32xf32>
    %c16_154 = arith.constant 16 : index
    %c32_155 = arith.constant 32 : index
    %374 = vector.load %arg6[%c16_154, %c32_155] : memref<64x64xf32, #tpu.memory_space<vmem>>, vector<8x32xf32>
    tpu.vector_store %arg6[%c16_154, %c32_155], %373 {strides = array<i32>} : memref<64x64xf32, #tpu.memory_space<vmem>>, vector<8x32xf32>,
    %c48_156 = arith.constant 48 : index
    %c0_157 = arith.constant 0 : index
    %375 = vector.load %arg4[%c48_156, %c0_157] : memref<64x256xf32, #tpu.memory_space<vmem>>, vector<8x256xf32>
    %c8_158 = arith.constant 8 : index
    %c0_159 = arith.constant 0 : index
    %376 = vector.load %arg4[%c8_158, %c0_159] : memref<64x256xf32, #tpu.memory_space<vmem>>, vector<8x256xf32>
    %377 = arith.select %18, %375, %376 : vector<8x256xi1>, vector<8x256xf32>
    %cst_160 = arith.constant dense<0.000000e+00> : vector<8x256xf32>
    %378 = tpu.matmul %370, %228, %cst_160 {dimension_numbers = #tpu.dot_dimension_numbers<[1], [0], [0], [1], [0, 0, 1, 1], [], []>} : vector<8x64xf32>, vector<64x256xf32>, vector<8x256xf32> -> vector<8x256xf32>
    %379 = arith.addf %377, %378 : vector<8x256xf32>
    %380 = arith.negf %379 : vector<8x256xf32>
    %381 = math.exp %380 : vector<8x256xf32>
    %cst_161 = arith.constant 1.000000e+00 : f32
    %382 = vector.broadcast %cst_161 : f32 to vector<8x256xf32>
    %383 = arith.addf %382, %381 : vector<8x256xf32>
    %384 = arith.divf %382, %383 : vector<8x256xf32>
    %385 = vector.extract_strided_slice %379 {offsets = [0, 192], sizes = [8, 64], strides = [1, 1]} : vector<8x256xf32> to vector<8x64xf32>
    %386 = math.tanh %385 : vector<8x64xf32>
    %387 = vector.extract_strided_slice %384 {offsets = [0, 64], sizes = [8, 64], strides = [1, 1]} : vector<8x256xf32> to vector<8x64xf32>
    %388 = arith.mulf %387, %367 : vector<8x64xf32>
    %389 = vector.extract_strided_slice %384 {offsets = [0, 0], sizes = [8, 64], strides = [1, 1]} : vector<8x256xf32> to vector<8x64xf32>
    %390 = arith.mulf %389, %386 : vector<8x64xf32>
    %391 = arith.addf %388, %390 : vector<8x64xf32>
    %392 = vector.extract_strided_slice %384 {offsets = [0, 128], sizes = [8, 64], strides = [1, 1]} : vector<8x256xf32> to vector<8x64xf32>
    %393 = math.tanh %391 : vector<8x64xf32>
    %394 = arith.mulf %392, %393 : vector<8x64xf32>
    %395 = vector.extract_strided_slice %394 {offsets = [0, 0], sizes = [8, 32], strides = [1, 1]} : vector<8x64xf32> to vector<8x32xf32>
    %c48_162 = arith.constant 48 : index
    %c0_163 = arith.constant 0 : index
    %396 = vector.load %arg6[%c48_162, %c0_163] : memref<64x64xf32, #tpu.memory_space<vmem>>, vector<8x32xf32>
    tpu.vector_store %arg6[%c48_162, %c0_163], %395 {strides = array<i32>} : memref<64x64xf32, #tpu.memory_space<vmem>>, vector<8x32xf32>,
    %397 = vector.extract_strided_slice %394 {offsets = [0, 32], sizes = [8, 32], strides = [1, 1]} : vector<8x64xf32> to vector<8x32xf32>
    %c8_164 = arith.constant 8 : index
    %c32_165 = arith.constant 32 : index
    %398 = vector.load %arg6[%c8_164, %c32_165] : memref<64x64xf32, #tpu.memory_space<vmem>>, vector<8x32xf32>
    tpu.vector_store %arg6[%c8_164, %c32_165], %397 {strides = array<i32>} : memref<64x64xf32, #tpu.memory_space<vmem>>, vector<8x32xf32>,
    %c56_166 = arith.constant 56 : index
    %c0_167 = arith.constant 0 : index
    %399 = vector.load %arg4[%c56_166, %c0_167] : memref<64x256xf32, #tpu.memory_space<vmem>>, vector<8x256xf32>
    %c0_168 = arith.constant 0 : index
    %c0_169 = arith.constant 0 : index
    %400 = vector.load %arg4[%c0_168, %c0_169] : memref<64x256xf32, #tpu.memory_space<vmem>>, vector<8x256xf32>
    %401 = arith.select %18, %399, %400 : vector<8x256xi1>, vector<8x256xf32>
    %cst_170 = arith.constant dense<0.000000e+00> : vector<8x256xf32>
    %402 = tpu.matmul %394, %228, %cst_170 {dimension_numbers = #tpu.dot_dimension_numbers<[1], [0], [0], [1], [0, 0, 1, 1], [], []>} : vector<8x64xf32>, vector<64x256xf32>, vector<8x256xf32> -> vector<8x256xf32>
    %403 = arith.addf %401, %402 : vector<8x256xf32>
    %404 = arith.negf %403 : vector<8x256xf32>
    %405 = math.exp %404 : vector<8x256xf32>
    %cst_171 = arith.constant 1.000000e+00 : f32
    %406 = vector.broadcast %cst_171 : f32 to vector<8x256xf32>
    %407 = arith.addf %406, %405 : vector<8x256xf32>
    %408 = arith.divf %406, %407 : vector<8x256xf32>
    %409 = vector.extract_strided_slice %403 {offsets = [0, 192], sizes = [8, 64], strides = [1, 1]} : vector<8x256xf32> to vector<8x64xf32>
    %410 = math.tanh %409 : vector<8x64xf32>
    %411 = vector.extract_strided_slice %408 {offsets = [0, 64], sizes = [8, 64], strides = [1, 1]} : vector<8x256xf32> to vector<8x64xf32>
    %412 = arith.mulf %411, %391 : vector<8x64xf32>
    %413 = vector.extract_strided_slice %408 {offsets = [0, 0], sizes = [8, 64], strides = [1, 1]} : vector<8x256xf32> to vector<8x64xf32>
    %414 = arith.mulf %413, %410 : vector<8x64xf32>
    %415 = arith.addf %412, %414 : vector<8x64xf32>
    %416 = vector.extract_strided_slice %408 {offsets = [0, 128], sizes = [8, 64], strides = [1, 1]} : vector<8x256xf32> to vector<8x64xf32>
    %417 = math.tanh %415 : vector<8x64xf32>
    %418 = arith.mulf %416, %417 : vector<8x64xf32>
    %419 = vector.extract_strided_slice %418 {offsets = [0, 0], sizes = [8, 32], strides = [1, 1]} : vector<8x64xf32> to vector<8x32xf32>
    %c56_172 = arith.constant 56 : index
    %c0_173 = arith.constant 0 : index
    %420 = vector.load %arg6[%c56_172, %c0_173] : memref<64x64xf32, #tpu.memory_space<vmem>>, vector<8x32xf32>
    tpu.vector_store %arg6[%c56_172, %c0_173], %419 {strides = array<i32>} : memref<64x64xf32, #tpu.memory_space<vmem>>, vector<8x32xf32>,
    %421 = vector.extract_strided_slice %418 {offsets = [0, 32], sizes = [8, 32], strides = [1, 1]} : vector<8x64xf32> to vector<8x32xf32>
    %c0_174 = arith.constant 0 : index
    %c32_175 = arith.constant 32 : index
    %422 = vector.load %arg6[%c0_174, %c32_175] : memref<64x64xf32, #tpu.memory_space<vmem>>, vector<8x32xf32>
    tpu.vector_store %arg6[%c0_174, %c32_175], %421 {strides = array<i32>} : memref<64x64xf32, #tpu.memory_space<vmem>>, vector<8x32xf32>,
    %c0_176 = arith.constant 0 : index
    %c0_177 = arith.constant 0 : index
    %423 = vector.load %arg6[%c0_176, %c0_177] : memref<64x64xf32, #tpu.memory_space<vmem>>, vector<64x64xf32>
    %c0_178 = arith.constant 0 : index
    %c0_179 = arith.constant 0 : index
    %424 = vector.load %arg2[%c0_178, %c0_179] : memref<72x32xf32, #tpu.memory_space<vmem>>, vector<64x32xf32>
    %cst_180 = arith.constant dense<0.000000e+00> : vector<64x32xf32>
    %425 = tpu.matmul %423, %424, %cst_180 {dimension_numbers = #tpu.dot_dimension_numbers<[1], [0], [0], [1], [0, 0, 1, 1], [], []>} : vector<64x64xf32>, vector<64x32xf32>, vector<64x32xf32> -> vector<64x32xf32>
    %c64 = arith.constant 64 : index
    %c0_181 = arith.constant 0 : index
    %426 = vector.load %arg2[%c64, %c0_181] : memref<72x32xf32, #tpu.memory_space<vmem>>, vector<1x32xf32>
    %427 = vector.broadcast %426 : vector<1x32xf32> to vector<64x32xf32>
    %428 = arith.addf %425, %427 : vector<64x32xf32>
    %cst_182 = arith.constant 0.000000e+00 : f32
    %429 = vector.broadcast %cst_182 : f32 to vector<64x32xf32>
    %430 = arith.maximumf %428, %429 : vector<64x32xf32>
    %c0_183 = arith.constant 0 : index
    %c0_184 = arith.constant 0 : index
    %431 = vector.load %arg3[%c0_183, %c0_184] : memref<64x32xf32, #tpu.memory_space<vmem>>, vector<64x32xf32>
    tpu.vector_store %arg3[%c0_183, %c0_184], %430 {strides = array<i32>} : memref<64x32xf32, #tpu.memory_space<vmem>>, vector<64x32xf32>,
    return
  }
}

</mosaic_0001>

<bundles_post_ra>
// kernel: tpu_custom_call.1
= control target key start
LH: loop header
LB: loop body
LE: loop exit
PB: predicated region body
PF: predicated region fallthrough
CT: control target
= control target key end

     0   :  { %8 = vsyncpa [#allocation6], 0  ;;  %s2798_s12 = smov [#allocation5]   ;;  %s3732_s0 = inlined_call_operand.vmem [shape: f32[64,32], index: 0, kind: input, shape index: {}]   ;;  %s3733_s1 = inlined_call_operand.hbm [shape: f32[240,256], index: 1, kind: input, shape index: {}]   ;;  %s3734_s2 = inlined_call_operand.vmem [shape: f32[72,32], index: 2, kind: input, shape index: {}]   ;;  %s3735_s3 = inlined_call_operand.vmem [shape: f32[64,32], index: 3, kind: output, shape index: {}]  }
   0x1   :  { %s16_s13 = sshll.u32 %s2798_s12, 4  ;;  %s17_s13 = int_to_ptr.vmem [resolvable:$true] %s16_s13 }
   0x2   :  { %s2784_s14 = scalar_lea.vmem %s17_s13, 7680  ;;  %p2789_p1 = scmp.lt.s32.totalorder %s17_s13, %s17_s13 }
   0x3   :  { %p2785_p0 = scmp.ne.s32.totalorder %s17_s13, %s2784_s14  ;;  %p2790_p2 = scmp.lt.s32.totalorder %s2784_s14, %s2784_s14 }
   0x5   :  { %p2791_p3 = por %p2790_p2, %p2789_p1 }
   0x7   :  { %p2792_p4 = pnand %p2791_p3, %p2785_p0 }
   0x9   :  { %2795 = shalt.err (!%p2792_p4)
}
   0xa   :  { %s2799_s15 = smov 256   ;;  %s2800_s16 = smov 16  }
   0xb   :  { %22 = dma.hbm_to_vmem [thread:$0]  %s3733_s1, 7680, %s17_s13, [#allocation6], %s2799_s15, %s2799_s15, %s2800_s16  }
   0xc   :  { %2796 = dma.done.wait [#allocation6], 7680  }
   0xd   :  { %2797 = vsyncadd [#allocation6], 4294959616  ;;  %v2801_v0 = vmov 0.0   ;;  %v72_v1 = vld [vmem:[#allocation5 + $0x38] sm:$0xff]  ;;  %v71_v2 = vld [vmem:[#allocation5 + $0x30] sm:$0xff]  ;;  %vm86_vm0 = vcmask 261120   ;;  %v28_v33 = vlaneseq }
   0xe   :  { %175 = vmatprep.mubr.f32.mxu0 %v2801_v0  ;;  %199 = vmatprep.mubr.f32.mxu1 %v2801_v0  ;;  %v70_v3 = vld [vmem:[#allocation5 + $0x28] sm:$0xff]  ;;  %v69_v4 = vld [vmem:[#allocation5 + $0x20] sm:$0xff]  ;;  %v68_v5 = vld [vmem:[#allocation5 + $0x18] sm:$0xff]  ;;  %vm370_vm3 = vcmask 523520   ;;  %vm262_vm4 = vcmask 523264  }
   0xf   :  { %135 = vmatprep.subr.mxu0 %v72_v1  ;;  %2571 = vmatprep.subr.mxu1 %v72_v1  ;;  %v67_v6 = vld [vmem:[#allocation5 + $0x10] sm:$0xff]  ;;  %v66_v7 = vld [vmem:[#allocation5 + $0x8] sm:$0xff]  ;;  %v65_v8 = vld [vmem:[#allocation5] sm:$0xff]  ;;  %v2952_v34 = vshrl.u32 %v28_v33, 7  ;;  %v29_v39 = vand.u32 127, %v28_v33 }
  0x10   :  { %136 = vmatpush1.msra.mxu0 %v71_v2  ;;  %2575 = vmatpush1.msra.mxu1 %v71_v2  ;;  %v57_v9 = vld [vmem:[%s3732_s0] sm:$0xff]  ;;  %v2834_v11 = vld [vmem:[#allocation5 + $0xb8] sm:$0xff]  ;;  %v2836_v12 = vld [vmem:[#allocation5 + $0xb0] sm:$0xff] }
  0x11   :  { %137 = vmatprep.subr.mxu0 %v70_v3  ;;  %2572 = vmatprep.subr.mxu1 %v70_v3  ;;  %v61_v10 = vld [vmem:[%s3732_s0 + $0x20] sm:$0xff]  ;;  %v2840_v13 = vld [vmem:[#allocation5 + $0xa8] sm:$0xff]  ;;  %v2854_v17 = vld [vmem:[#allocation5 + $0x98] sm:$0xff]  ;;  %v3737_v35 = vsub.s32 0, %v2952_v34  ;;  %v3736_v37 = vsub.s32 1, %v2952_v34  ;;  %v30_v45 = vadd.s32 128, %v29_v39 }
  0x12   :  { %138 = vmatpush1.msra.mxu0 %v69_v4  ;;  %2576 = vmatpush1.msra.mxu1 %v69_v4  ;;  %v2844_v14 = vld [vmem:[#allocation5 + $0xa0] sm:$0xff]  ;;  %v58_v15 = vld [vmem:[%s3732_s0 + $0x8] sm:$0xff]  ;;  %v2857_v18 = vld [vmem:[#allocation5 + $0x90] sm:$0xff]  ;;  %v35_v49 = vand.u32 63, %v29_v39 }
  0x13   :  { %139 = vmatprep.subr.mxu0 %v68_v5  ;;  %2573 = vmatprep.subr.mxu1 %v68_v5  ;;  %v62_v16 = vld [vmem:[%s3732_s0 + $0x28] sm:$0xff]  ;;  %v2866_v20 = vld [vmem:[#allocation5 + $0x80] sm:$0xff]  ;;  %v59_v21 = vld [vmem:[%s3732_s0 + $0x10] sm:$0xff]  ;;  %v42_v53 = vand.u32 63, %v30_v45 }
  0x14   :  { %140 = vmatpush1.msra.mxu0 %v67_v6  ;;  %2577 = vmatpush1.msra.mxu1 %v67_v6  ;;  %v2862_v19 = vld [vmem:[#allocation5 + $0x88] sm:$0xff]  ;;  %v63_v22 = vld [vmem:[%s3732_s0 + $0x30] sm:$0xff]  ;;  %v2876_v23 = vld [vmem:[#allocation5 + $0x78] sm:$0xff]  ;;  %vm2970_vm1 = vcmp.lt.s32.totalorder %v35_v49, 32 }
  0x15   :  { %141 = vmatprep.subr.mxu0 %v66_v7  ;;  %2574 = vmatprep.subr.mxu1 %v66_v7  ;;  %v2880_v24 = vld [vmem:[#allocation5 + $0x70] sm:$0xff]  ;;  %v2884_v25 = vld [vmem:[#allocation5 + $0x68] sm:$0xff]  ;;  %v2888_v26 = vld [vmem:[#allocation5 + $0x60] sm:$0xff]  ;;  %vm2978_vm2 = vcmp.lt.s32.totalorder %v42_v53, 32 }
  0x16   :  { %142 = vmatpush1.msra.mxu0 %v65_v8  ;;  %2578 = vmatpush1.msra.mxu1 %v65_v8  ;;  %v60_v27 = vld [vmem:[%s3732_s0 + $0x18] sm:$0xff]  ;;  %v2902_v30 = vld [vmem:[#allocation5 + $0x50] sm:$0xff]  ;;  %v2906_v31 = vld [vmem:[#allocation5 + $0x48] sm:$0xff] }
  0x17   :  { %2456 = vmatmul.mubr.msk.f32.vlgmr.msra.gmra.mxu0 %vm86_vm0, %v57_v9  ;;  %2460 = vmatmul.mubr.msk.f32.vlgmr.msra.gmra.mxu1 %vm86_vm0, %v61_v10  ;;  %v64_v28 = vld [vmem:[%s3732_s0 + $0x38] sm:$0xff]  ;;  %v2910_v32 = vld [vmem:[#allocation5 + $0x40] sm:$0xff]  ;;  %s2802_s0 = smov 64  }
  0x18   :  { %282 = vmatprep.subr.mxu1 %v2834_v11  ;;  %181 = vmatprep.mubr.f32.mxu0 %v2801_v0  ;;  %v2898_v29 = vld [vmem:[#allocation5 + $0x58] sm:$0xff]  ;;  %v74_v36 = vld [vmem:[#allocation5 + $0x1c0] ss:$8 sm:$0x3] }
  0x19   :  { %283 = vmatpush1.msra.mxu1 %v2836_v12  ;;  %205 = vmatprep.mubr.f32.mxu1 %v2801_v0  ;;  %v79_v38 = vrot.slane %v74_v36, %v3737_v35  ;;  %v83_v40 = vrot.slane %v74_v36, %v3736_v37  ;;  %v2300_v62 = vld [vmem:[%s3734_s2 + $0x38] sm:$0xff] }
  0x1a   :  { %284 = vmatprep.subr.mxu1 %v2840_v13  ;;  %511 = vmatprep.subr.mxu0 %v2834_v11 }
  0x1b   :  { %285 = vmatpush1.msra.mxu1 %v2844_v14  ;;  %2457 = vmatmul.mubr.msk.f32.gmra.mxu0 %vm86_vm0, %v58_v15 }
  0x1c   :  { %2461 = vmatmul.mubr.msk.f32.gmra.mxu1 %vm86_vm0, %v62_v16  ;;  %286 = vmatprep.subr.mxu1 %v2854_v17 }
  0x1d   :  { %287 = vmatpush1.msra.mxu1 %v2857_v18  ;;  %187 = vmatprep.mubr.f32.mxu0 %v2801_v0 }
  0x1e   :  { %288 = vmatprep.subr.mxu1 %v2862_v19  ;;  %211 = vmatprep.mubr.f32.mxu1 %v2801_v0 }
  0x1f   :  { %289 = vmatpush1.msra.mxu1 %v2866_v20  ;;  %2458 = vmatmul.mubr.msk.f32.gmra.mxu0 %vm86_vm0, %v59_v21 }
  0x20   :  { %2462 = vmatmul.mubr.msk.f32.gmra.mxu1 %vm86_vm0, %v63_v22  ;;  %290 = vmatprep.subr.mxu1 %v2876_v23 }
  0x21   :  { %291 = vmatpush1.msra.mxu1 %v2880_v24  ;;  %193 = vmatprep.mubr.f32.mxu0 %v2801_v0 }
  0x22   :  { %292 = vmatprep.subr.mxu1 %v2884_v25  ;;  %217 = vmatprep.mubr.f32.mxu1 %v2801_v0 }
  0x23   :  { %293 = vmatpush1.msra.mxu1 %v2888_v26  ;;  %2459 = vmatmul.mubr.msk.f32.gmra.mxu0 %vm86_vm0, %v60_v27 }
  0x24   :  { %2463 = vmatmul.mubr.msk.f32.gmra.mxu1 %vm86_vm0, %v64_v28  ;;  %294 = vmatprep.subr.mxu1 %v2898_v29 }
  0x25   :  { %295 = vmatpush1.msra.mxu1 %v2902_v30  ;;  %330 = vmatprep.mubr.f32.mxu1 %v2801_v0 }
  0x26   :  { %296 = vmatprep.subr.mxu1 %v2906_v31  ;;  %512 = vmatpush1.msra.mxu0 %v2836_v12 }
  0x27   :  { %297 = vmatpush1.msra.mxu1 %v2910_v32  ;;  %513 = vmatprep.subr.mxu0 %v2840_v13 }
  0x28   :  { %331 = vmatmul.mubr.f32.vlgmr.msra.gmra.mxu1 %v2801_v0  ;;  %397 = vmatprep.subr.mxu1 %v2834_v11 }
  0x29   :  { %398 = vmatpush1.msra.mxu1 %v2836_v12  ;;  %445 = vmatprep.mubr.f32.mxu1 %v2801_v0 }
  0x2a   :  { %399 = vmatprep.subr.mxu1 %v2840_v13  ;;  %514 = vmatpush1.msra.mxu0 %v2844_v14 }
  0x2b   :  { %400 = vmatpush1.msra.mxu1 %v2844_v14  ;;  %515 = vmatprep.subr.mxu0 %v2854_v17 }
  0x2c   :  { %401 = vmatprep.subr.mxu1 %v2854_v17  ;;  %516 = vmatpush1.msra.mxu0 %v2857_v18 }
  0x2d   :  { %402 = vmatpush1.msra.mxu1 %v2857_v18  ;;  %517 = vmatprep.subr.mxu0 %v2862_v19 }
  0x2e   :  { %403 = vmatprep.subr.mxu1 %v2862_v19  ;;  %518 = vmatpush1.msra.mxu0 %v2866_v20 }
  0x2f   :  { %404 = vmatpush1.msra.mxu1 %v2866_v20  ;;  %519 = vmatprep.subr.mxu0 %v2876_v23 }
  0x30   :  { %405 = vmatprep.subr.mxu1 %v2876_v23  ;;  %520 = vmatpush1.msra.mxu0 %v2880_v24 }
  0x31   :  { %406 = vmatpush1.msra.mxu1 %v2880_v24  ;;  %521 = vmatprep.subr.mxu0 %v2884_v25 }
  0x32   :  { %407 = vmatprep.subr.mxu1 %v2884_v25  ;;  %522 = vmatpush1.msra.mxu0 %v2888_v26 }
  0x33   :  { %408 = vmatpush1.msra.mxu1 %v2888_v26  ;;  %523 = vmatprep.subr.mxu0 %v2898_v29 }
  0x34   :  { %409 = vmatprep.subr.mxu1 %v2898_v29  ;;  %524 = vmatpush1.msra.mxu0 %v2902_v30 }
  0x35   :  { %410 = vmatpush1.msra.mxu1 %v2902_v30  ;;  %525 = vmatprep.subr.mxu0 %v2906_v31 }
  0x36   :  { %411 = vmatprep.subr.mxu1 %v2906_v31  ;;  %526 = vmatpush1.msra.mxu0 %v2910_v32 }
  0x37   :  { %412 = vmatpush1.msra.mxu1 %v2910_v32  ;;  %559 = vmatprep.mubr.f32.mxu0 %v2801_v0 }
  0x38   :  { %625 = vmatprep.subr.mxu1 %v2834_v11  ;;  %739 = vmatprep.subr.mxu0 %v2834_v11 }
  0xd7   :  { %v177_v41 = vpop.f32.mrf.mxu0  ;;  %v201_v42 = vpop.f32.mrf.mxu1 }
  0xd8   :  { %v2960_v43 = vadd.f32 %v177_v41, %v79_v38  ;;  %v2962_v44 = vadd.f32 %v201_v42, %v79_v38 }
  0xd9   :  { %v179_v46 = vpop.f32.mrf.mxu0  ;;  %v203_v47 = vpop.f32.mrf.mxu1 }
  0xda   :  { %v2964_v48 = vadd.f32 %v203_v47, %v83_v40  ;;  %v3016_v27 = vadd.f32 %v179_v46, %v83_v40 }
  0xdb   :  { %v183_v50 = vpop.f32.mrf.mxu0 }
  0xdc   :  { %v2966_v51 = vadd.f32 %v183_v50, %v79_v38  ;;  %v207_v52 = vpop.f32.mrf.mxu1 }
  0xdd   :  { %v2968_v54 = vadd.f32 %v207_v52, %v79_v38  ;;  %v185_v55 = vpop.f32.mrf.mxu0 }
  0xde   :  { %v209_v56 = vpop.f32.mrf.mxu1  ;;  %v2982_v63 = vadd.f32 %v185_v55, %v83_v40 }
  0xdf   :  { %v2974_v58 = vadd.f32 %v209_v56, %v83_v40  ;;  %v189_v59 = vpop.f32.mrf.mxu0 }
  0xe0   :  { %v2976_v60 = vadd.f32 %v189_v59, %v79_v38  ;;  %v213_v61 = vpop.f32.mrf.mxu1 }
  0xe1   :  { %v2984_v1 = vadd.f32 %v213_v61, %v79_v38  ;;  %v191_v2 = vpop.f32.mrf.mxu0 }
  0xe2   :  { %v2986_v3 = vadd.f32 %v191_v2, %v83_v40  ;;  %v215_v4 = vpop.f32.mrf.mxu1  ;;  %v490_v5 = vsel %vm2970_vm1, %v2976_v60, %v2968_v54  ;;  %v832_v6 = vsel %vm2970_vm1, %v2968_v54, %v2976_v60 }
  0xe3   :  { %v2996_v7 = vadd.f32 %v215_v4, %v83_v40  ;;  %v195_v8 = vpop.f32.mrf.mxu0  ;;  %v376_v9 = vsel %vm2970_vm1, %v2966_v51, %v2984_v1  ;;  %v946_v10 = vsel %vm2970_vm1, %v2984_v1, %v2966_v51 }
  0xe4   :  { %v3006_v15 = vadd.f32 %v195_v8, %v79_v38  ;;  %v219_v16 = vpop.f32.mrf.mxu1  ;;  %v491_v21 = vsel %vm2978_vm2, %v2986_v3, %v2974_v58  ;;  %v833_v22 = vsel %vm2978_vm2, %v2974_v58, %v2986_v3 }
  0xe5   :  { %v3018_v28 = vadd.f32 %v219_v16, %v79_v38  ;;  %v197_v33 = vpop.f32.mrf.mxu0  ;;  %v377_v36 = vsel %vm2978_vm2, %v2982_v63, %v2996_v7  ;;  %v947_v39 = vsel %vm2978_vm2, %v2996_v7, %v2982_v63 }
  0xe6   :  { %v3028_v41 = vadd.f32 %v197_v33, %v83_v40  ;;  %v221_v42 = vpop.f32.mrf.mxu1  ;;  %v604_v38 = vsel %vm2970_vm1, %v3006_v15, %v2962_v44  ;;  %v718_v45 = vsel %vm2970_vm1, %v2962_v44, %v3006_v15 }
  0xe7   :  { %v3038_v46 = vadd.f32 %v221_v42, %v83_v40  ;;  %v260_v47 = vsel %vm2970_vm1, %v2960_v43, %v3018_v28  ;;  %v1060_v49 = vsel %vm2970_vm1, %v3018_v28, %v2960_v43 }
  0xe8   :  { %v332_v50 = vpop.f32.mrf.mxu1  ;;  %v605_v52 = vsel %vm2978_vm2, %v3028_v41, %v2964_v48  ;;  %v719_v40 = vsel %vm2978_vm2, %v2964_v48, %v3028_v41 }
  0xe9   :  { %v337_v53 = vadd.f32 %v332_v50, %v260_v47  ;;  %v261_v55 = vsel %vm2978_vm2, %v3016_v27, %v3038_v46  ;;  %v1061_v56 = vsel %vm2978_vm2, %v3038_v46, %v3016_v27  ;;  %v1191_v27 = vld [vmem:[#allocation5 + $0x128] sm:$0xff]  ;;  %v1190_v46 = vld [vmem:[#allocation5 + $0x120] sm:$0xff] }
  0xea   :  { %v334_v59 = vpop.f32.mrf.mxu1 }
  0xeb   :  { %v338_v61 = vadd.f32 %v334_v59, %v261_v55  ;;  %v2464_v4 = vmul.f32 -1.442695, %v337_v53 }
  0xed   :  { %2584 = vtanh.f32 %v338_v61  ;;  %v2465_v59 = vmul.f32 -1.442695, %v338_v61 }
  0xee   :  { %2586 = vpow2.f32 %v2464_v4 }
  0xfa   :  { %v2585_v2 = vpop.eup %2584 }
  0xfb   :  { %354 = vrot.lane.b32.xlu0 %v2585_v2, %s2802_s0  ;;  %v2587_v8 = vpop.eup %2586 }
  0xfc   :  { %v345_v16 = vadd.f32 1.0, %v2587_v8 }
  0xfe   :  { %2588 = vrcp.f32 %v345_v16 }
 0x10b   :  { %v2589_v33 = vpop.eup %2588 }
 0x10c   :  { %v352_v50 = vmul.f32 0.0, %v2589_v33 }
 0x16d   :  { %v355_v42 = vpop.permute.xlu0 %354 }
 0x16e   :  { %v357_v47 = vmul.f32 %v2589_v33, %v355_v42 }
 0x170   :  { %359 = vrot.lane.b32.xlu0 %v357_v47, %s2802_s0 }
 0x1e2   :  { %v360_v37 = vpop.permute.xlu0 %359 }
 0x1e3   :  { %v362_v35 = vadd.f32 %v360_v37, %v352_v50 }
 0x1e5   :  { %2590 = vtanh.f32 %v362_v35 }
 0x1e6   :  { %2592 = vpow2.f32 %v2465_v59 }
 0x1f2   :  { %v2591_v55 = vpop.eup %2590 }
 0x1f3   :  { %365 = vrot.lane.b32.xlu1 %v2591_v55, %s2802_s0  ;;  %v2593_v2 = vpop.eup %2592 }
 0x1f4   :  { %v346_v53 = vadd.f32 1.0, %v2593_v2 }
 0x1f6   :  { %2594 = vrcp.f32 %v346_v53 }
 0x203   :  { %v2595_v4 = vpop.eup %2594 }
 0x265   :  { %v366_v8 = vpop.permute.xlu1 %365 }
 0x266   :  { %v368_v16 = vmul.f32 %v2595_v4, %v366_v8 }
 0x268   :  { %369 = vst.msk [vmem:[#allocation3] sm:$0xff] %vm86_vm0, %v368_v16  ;;  %2466 = vmatmul.mubr.msk.f32.vlgmr.msra.gmra.mxu1 %vm262_vm4, %v368_v16 }
 0x269   :  { %371 = vst.msk [vmem:[#allocation3 + $0x38] sm:$0xff] %vm370_vm3, %v368_v16  ;;  %626 = vmatpush1.msra.mxu1 %v2836_v12  ;;  %673 = vmatprep.mubr.f32.mxu1 %v2801_v0 }
 0x26a   :  { %627 = vmatprep.subr.mxu1 %v2840_v13 }
 0x26b   :  { %628 = vmatpush1.msra.mxu1 %v2844_v14 }
 0x26c   :  { %629 = vmatprep.subr.mxu1 %v2854_v17 }
 0x26d   :  { %630 = vmatpush1.msra.mxu1 %v2857_v18 }
 0x26e   :  { %631 = vmatprep.subr.mxu1 %v2862_v19 }
 0x26f   :  { %632 = vmatpush1.msra.mxu1 %v2866_v20 }
 0x270   :  { %633 = vmatprep.subr.mxu1 %v2876_v23 }
 0x271   :  { %634 = vmatpush1.msra.mxu1 %v2880_v24 }
 0x272   :  { %635 = vmatprep.subr.mxu1 %v2884_v25 }
 0x273   :  { %636 = vmatpush1.msra.mxu1 %v2888_v26 }
 0x274   :  { %637 = vmatprep.subr.mxu1 %v2898_v29 }
 0x275   :  { %638 = vmatpush1.msra.mxu1 %v2902_v30 }
 0x276   :  { %639 = vmatprep.subr.mxu1 %v2906_v31 }
 0x277   :  { %640 = vmatpush1.msra.mxu1 %v2910_v32 }
 0x278   :  { %853 = vmatprep.subr.mxu1 %v2834_v11 }
 0x328   :  { %v447_v37 = vpop.f32.mrf.mxu1 }
 0x329   :  { %v452_v61 = vadd.f32 %v447_v37, %v376_v9 }
 0x32a   :  { %v449_v33 = vpop.f32.mrf.mxu1 }
 0x32b   :  { %v453_v42 = vadd.f32 %v449_v33, %v377_v36  ;;  %v2467_v50 = vmul.f32 -1.442695, %v452_v61 }
 0x32d   :  { %2596 = vtanh.f32 %v453_v42  ;;  %v2468_v36 = vmul.f32 -1.442695, %v453_v42 }
 0x32e   :  { %2598 = vpow2.f32 %v2467_v50 }
 0x33a   :  { %v2597_v47 = vpop.eup %2596 }
 0x33b   :  { %469 = vrot.lane.b32.xlu1 %v2597_v47, %s2802_s0  ;;  %v2599_v55 = vpop.eup %2598 }
 0x33c   :  { %v460_v59 = vadd.f32 1.0, %v2599_v55 }
 0x33e   :  { %2600 = vrcp.f32 %v460_v59 }
 0x34b   :  { %v2601_v2 = vpop.eup %2600 }
 0x34c   :  { %v467_v9 = vmul.f32 %v2601_v2, %v362_v35 }
 0x3ad   :  { %v470_v53 = vpop.permute.xlu1 %469 }
 0x3ae   :  { %v472_v4 = vmul.f32 %v2601_v2, %v470_v53 }
 0x3b0   :  { %474 = vrot.lane.b32.xlu0 %v472_v4, %s2802_s0 }
 0x422   :  { %v475_v8 = vpop.permute.xlu0 %474 }
 0x423   :  { %v477_v16 = vadd.f32 %v475_v8, %v467_v9 }
 0x425   :  { %2602 = vtanh.f32 %v477_v16 }
 0x426   :  { %2604 = vpow2.f32 %v2468_v36 }
 0x432   :  { %v2603_v37 = vpop.eup %2602 }
 0x433   :  { %480 = vrot.lane.b32.xlu1 %v2603_v37, %s2802_s0  ;;  %v2605_v33 = vpop.eup %2604 }
 0x434   :  { %v461_v61 = vadd.f32 1.0, %v2605_v33 }
 0x436   :  { %2606 = vrcp.f32 %v461_v61 }
 0x443   :  { %v2607_v47 = vpop.eup %2606 }
 0x4a5   :  { %v481_v50 = vpop.permute.xlu1 %480 }
 0x4a6   :  { %v483_v55 = vmul.f32 %v2607_v47, %v481_v50 }
 0x4a8   :  { %484 = vst.msk [vmem:[#allocation3 + $0x8] sm:$0xff] %vm86_vm0, %v483_v55  ;;  %2469 = vmatmul.mubr.msk.f32.vlgmr.msra.gmra.mxu0 %vm262_vm4, %v483_v55 }
 0x4a9   :  { %485 = vst.msk [vmem:[#allocation3 + $0x30] sm:$0xff] %vm370_vm3, %v483_v55  ;;  %740 = vmatpush1.msra.mxu0 %v2836_v12  ;;  %787 = vmatprep.mubr.f32.mxu0 %v2801_v0 }
 0x4aa   :  { %741 = vmatprep.subr.mxu0 %v2840_v13 }
 0x4ab   :  { %742 = vmatpush1.msra.mxu0 %v2844_v14 }
 0x4ac   :  { %743 = vmatprep.subr.mxu0 %v2854_v17 }
 0x4ad   :  { %744 = vmatpush1.msra.mxu0 %v2857_v18 }
 0x4ae   :  { %745 = vmatprep.subr.mxu0 %v2862_v19 }
 0x4af   :  { %746 = vmatpush1.msra.mxu0 %v2866_v20 }
 0x4b0   :  { %747 = vmatprep.subr.mxu0 %v2876_v23 }
 0x4b1   :  { %748 = vmatpush1.msra.mxu0 %v2880_v24 }
 0x4b2   :  { %749 = vmatprep.subr.mxu0 %v2884_v25 }
 0x4b3   :  { %750 = vmatpush1.msra.mxu0 %v2888_v26 }
 0x4b4   :  { %751 = vmatprep.subr.mxu0 %v2898_v29 }
 0x4b5   :  { %752 = vmatpush1.msra.mxu0 %v2902_v30 }
 0x4b6   :  { %753 = vmatprep.subr.mxu0 %v2906_v31 }
 0x4b7   :  { %754 = vmatpush1.msra.mxu0 %v2910_v32 }
 0x4b8   :  { %967 = vmatprep.subr.mxu0 %v2834_v11 }
 0x568   :  { %v561_v35 = vpop.f32.mrf.mxu0 }
 0x569   :  { %v566_v42 = vadd.f32 %v561_v35, %v490_v5 }
 0x56a   :  { %v563_v59 = vpop.f32.mrf.mxu0 }
 0x56b   :  { %v567_v2 = vadd.f32 %v563_v59, %v491_v21  ;;  %v2470_v4 = vmul.f32 -1.442695, %v566_v42 }
 0x56d   :  { %2608 = vtanh.f32 %v567_v2  ;;  %v2471_v21 = vmul.f32 -1.442695, %v567_v2 }
 0x56e   :  { %2610 = vpow2.f32 %v2470_v4 }
 0x57a   :  { %v2609_v53 = vpop.eup %2608 }
 0x57b   :  { %583 = vrot.lane.b32.xlu0 %v2609_v53, %s2802_s0  ;;  %v2611_v9 = vpop.eup %2610 }
 0x57c   :  { %v574_v8 = vadd.f32 1.0, %v2611_v9 }
 0x57e   :  { %2612 = vrcp.f32 %v574_v8 }
 0x58b   :  { %v2613_v37 = vpop.eup %2612 }
 0x58c   :  { %v581_v5 = vmul.f32 %v2613_v37, %v477_v16 }
 0x5ed   :  { %v584_v36 = vpop.permute.xlu0 %583 }
 0x5ee   :  { %v586_v33 = vmul.f32 %v2613_v37, %v584_v36 }
 0x5f0   :  { %588 = vrot.lane.b32.xlu1 %v586_v33, %s2802_s0 }
 0x662   :  { %v589_v61 = vpop.permute.xlu1 %588 }
 0x663   :  { %v591_v47 = vadd.f32 %v589_v61, %v581_v5 }
 0x665   :  { %2614 = vtanh.f32 %v591_v47 }
 0x666   :  { %2616 = vpow2.f32 %v2471_v21 }
 0x672   :  { %v2615_v50 = vpop.eup %2614 }
 0x673   :  { %594 = vrot.lane.b32.xlu0 %v2615_v50, %s2802_s0  ;;  %v2617_v55 = vpop.eup %2616 }
 0x674   :  { %v575_v35 = vadd.f32 1.0, %v2617_v55 }
 0x676   :  { %2618 = vrcp.f32 %v575_v35 }
 0x683   :  { %v2619_v42 = vpop.eup %2618 }
 0x6e5   :  { %v595_v59 = vpop.permute.xlu0 %594 }
 0x6e6   :  { %v597_v53 = vmul.f32 %v2619_v42, %v595_v59 }
 0x6e8   :  { %598 = vst.msk [vmem:[#allocation3 + $0x10] sm:$0xff] %vm86_vm0, %v597_v53  ;;  %2472 = vmatmul.mubr.msk.f32.vlgmr.msra.gmra.mxu1 %vm262_vm4, %v597_v53 }
 0x6e9   :  { %599 = vst.msk [vmem:[#allocation3 + $0x28] sm:$0xff] %vm370_vm3, %v597_v53  ;;  %854 = vmatpush1.msra.mxu1 %v2836_v12  ;;  %901 = vmatprep.mubr.f32.mxu1 %v2801_v0 }
 0x6ea   :  { %855 = vmatprep.subr.mxu1 %v2840_v13 }
 0x6eb   :  { %856 = vmatpush1.msra.mxu1 %v2844_v14 }
 0x6ec   :  { %857 = vmatprep.subr.mxu1 %v2854_v17 }
 0x6ed   :  { %858 = vmatpush1.msra.mxu1 %v2857_v18 }
 0x6ee   :  { %859 = vmatprep.subr.mxu1 %v2862_v19 }
 0x6ef   :  { %860 = vmatpush1.msra.mxu1 %v2866_v20 }
 0x6f0   :  { %861 = vmatprep.subr.mxu1 %v2876_v23 }
 0x6f1   :  { %862 = vmatpush1.msra.mxu1 %v2880_v24 }
 0x6f2   :  { %863 = vmatprep.subr.mxu1 %v2884_v25 }
 0x6f3   :  { %864 = vmatpush1.msra.mxu1 %v2888_v26 }
 0x6f4   :  { %865 = vmatprep.subr.mxu1 %v2898_v29 }
 0x6f5   :  { %866 = vmatpush1.msra.mxu1 %v2902_v30 }
 0x6f6   :  { %867 = vmatprep.subr.mxu1 %v2906_v31 }
 0x6f7   :  { %868 = vmatpush1.msra.mxu1 %v2910_v32 }
 0x6f8   :  { %1081 = vmatprep.subr.mxu1 %v2834_v11 }
 0x7a8   :  { %v675_v16 = vpop.f32.mrf.mxu1 }
 0x7a9   :  { %v680_v2 = vadd.f32 %v675_v16, %v604_v38 }
 0x7aa   :  { %v677_v4 = vpop.f32.mrf.mxu1 }
 0x7ab   :  { %v681_v9 = vadd.f32 %v677_v4, %v605_v52  ;;  %v2473_v37 = vmul.f32 -1.442695, %v680_v2 }
 0x7ad   :  { %2620 = vtanh.f32 %v681_v9  ;;  %v2474_v52 = vmul.f32 -1.442695, %v681_v9 }
 0x7ae   :  { %2622 = vpow2.f32 %v2473_v37 }
 0x7ba   :  { %v2621_v8 = vpop.eup %2620 }
 0x7bb   :  { %697 = vrot.lane.b32.xlu1 %v2621_v8, %s2802_s0  ;;  %v2623_v11 = vpop.eup %2622 }
 0x7bc   :  { %v688_v36 = vadd.f32 1.0, %v2623_v11 }
 0x7be   :  { %2624 = vrcp.f32 %v688_v36 }
 0x7cb   :  { %v2625_v33 = vpop.eup %2624 }
 0x7cc   :  { %v695_v38 = vmul.f32 %v2625_v33, %v591_v47 }
 0x82d   :  { %v698_v5 = vpop.permute.xlu1 %697 }
 0x82e   :  { %v700_v61 = vmul.f32 %v2625_v33, %v698_v5 }
 0x830   :  { %702 = vrot.lane.b32.xlu0 %v700_v61, %s2802_s0 }
 0x8a2   :  { %v703_v50 = vpop.permute.xlu0 %702 }
 0x8a3   :  { %v705_v21 = vadd.f32 %v703_v50, %v695_v38 }
 0x8a5   :  { %2626 = vtanh.f32 %v705_v21 }
 0x8a6   :  { %2628 = vpow2.f32 %v2474_v52 }
 0x8b2   :  { %v2627_v55 = vpop.eup %2626 }
 0x8b3   :  { %708 = vrot.lane.b32.xlu1 %v2627_v55, %s2802_s0  ;;  %v2629_v35 = vpop.eup %2628 }
 0x8b4   :  { %v689_v42 = vadd.f32 1.0, %v2629_v35 }
 0x8b6   :  { %2630 = vrcp.f32 %v689_v42 }
 0x8c3   :  { %v2631_v59 = vpop.eup %2630 }
 0x925   :  { %v709_v53 = vpop.permute.xlu1 %708 }
 0x926   :  { %v711_v16 = vmul.f32 %v2631_v59, %v709_v53 }
 0x928   :  { %712 = vst.msk [vmem:[#allocation3 + $0x18] sm:$0xff] %vm86_vm0, %v711_v16  ;;  %2475 = vmatmul.mubr.msk.f32.vlgmr.msra.gmra.mxu0 %vm262_vm4, %v711_v16 }
 0x929   :  { %713 = vst.msk [vmem:[#allocation3 + $0x20] sm:$0xff] %vm370_vm3, %v711_v16  ;;  %968 = vmatpush1.msra.mxu0 %v2836_v12  ;;  %1015 = vmatprep.mubr.f32.mxu0 %v2801_v0 }
 0x92a   :  { %969 = vmatprep.subr.mxu0 %v2840_v13 }
 0x92b   :  { %970 = vmatpush1.msra.mxu0 %v2844_v14 }
 0x92c   :  { %971 = vmatprep.subr.mxu0 %v2854_v17 }
 0x92d   :  { %972 = vmatpush1.msra.mxu0 %v2857_v18 }
 0x92e   :  { %973 = vmatprep.subr.mxu0 %v2862_v19 }
 0x92f   :  { %974 = vmatpush1.msra.mxu0 %v2866_v20 }
 0x930   :  { %975 = vmatprep.subr.mxu0 %v2876_v23 }
 0x931   :  { %976 = vmatpush1.msra.mxu0 %v2880_v24 }
 0x932   :  { %977 = vmatprep.subr.mxu0 %v2884_v25 }
 0x933   :  { %978 = vmatpush1.msra.mxu0 %v2888_v26 }
 0x934   :  { %979 = vmatprep.subr.mxu0 %v2898_v29 }
 0x935   :  { %980 = vmatpush1.msra.mxu0 %v2902_v30 }
 0x936   :  { %981 = vmatprep.subr.mxu0 %v2906_v31 }
 0x937   :  { %982 = vmatpush1.msra.mxu0 %v2910_v32 }
 0x9e8   :  { %v789_v47 = vpop.f32.mrf.mxu0 }
 0x9e9   :  { %v794_v2 = vadd.f32 %v789_v47, %v718_v45 }
 0x9ea   :  { %v791_v4 = vpop.f32.mrf.mxu0 }
 0x9eb   :  { %v795_v9 = vadd.f32 %v791_v4, %v719_v40  ;;  %v2476_v37 = vmul.f32 -1.442695, %v794_v2 }
 0x9ed   :  { %2632 = vtanh.f32 %v795_v9  ;;  %v2477_v41 = vmul.f32 -1.442695, %v795_v9 }
 0x9ee   :  { %2634 = vpow2.f32 %v2476_v37 }
 0x9fa   :  { %v2633_v8 = vpop.eup %2632 }
 0x9fb   :  { %811 = vrot.lane.b32.xlu0 %v2633_v8, %s2802_s0  ;;  %v2635_v11 = vpop.eup %2634 }
 0x9fc   :  { %v802_v36 = vadd.f32 1.0, %v2635_v11 }
 0x9fe   :  { %2636 = vrcp.f32 %v802_v36 }
 0xa0b   :  { %v2637_v33 = vpop.eup %2636 }
 0xa0c   :  { %v809_v15 = vmul.f32 %v2637_v33, %v705_v21 }
 0xa6d   :  { %v812_v5 = vpop.permute.xlu0 %811 }
 0xa6e   :  { %v814_v44 = vmul.f32 %v2637_v33, %v812_v5 }
 0xa70   :  { %816 = vrot.lane.b32.xlu1 %v814_v44, %s2802_s0 }
 0xae2   :  { %v817_v45 = vpop.permute.xlu1 %816 }
 0xae3   :  { %v819_v61 = vadd.f32 %v817_v45, %v809_v15 }
 0xae5   :  { %2638 = vtanh.f32 %v819_v61 }
 0xae6   :  { %2640 = vpow2.f32 %v2477_v41 }
 0xaf2   :  { %v2639_v48 = vpop.eup %2638 }
 0xaf3   :  { %822 = vrot.lane.b32.xlu0 %v2639_v48, %s2802_s0  ;;  %v2641_v40 = vpop.eup %2640 }
 0xaf4   :  { %v803_v38 = vadd.f32 1.0, %v2641_v40 }
 0xaf6   :  { %2642 = vrcp.f32 %v803_v38  ;;  %v1193_v38 = vld [vmem:[#allocation5 + $0x138] sm:$0xff] }
 0xaf7   :  { %1247 = vmatprep.subr.mxu0 %v1193_v38 }
 0xb03   :  { %v2643_v50 = vpop.eup %2642 }
 0xb65   :  { %v823_v55 = vpop.permute.xlu0 %822 }
 0xb66   :  { %v825_v52 = vmul.f32 %v2643_v50, %v823_v55  ;;  %v1192_v50 = vld [vmem:[#allocation5 + $0x130] sm:$0xff] }
 0xb67   :  { %v1188_v55 = vld [vmem:[#allocation5 + $0x110] sm:$0xff] }
 0xb68   :  { %826 = vst.msk [vmem:[#allocation3 + $0x20] sm:$0xff] %vm86_vm0, %v825_v52  ;;  %2478 = vmatmul.mubr.msk.f32.vlgmr.msra.gmra.mxu1 %vm262_vm4, %v825_v52 }
 0xb69   :  { %827 = vst.msk [vmem:[#allocation3 + $0x18] sm:$0xff] %vm370_vm3, %v825_v52  ;;  %1082 = vmatpush1.msra.mxu1 %v2836_v12  ;;  %1129 = vmatprep.mubr.f32.mxu1 %v2801_v0 }
 0xb6a   :  { %1083 = vmatprep.subr.mxu1 %v2840_v13 }
 0xb6b   :  { %1084 = vmatpush1.msra.mxu1 %v2844_v14 }
 0xb6c   :  { %1085 = vmatprep.subr.mxu1 %v2854_v17 }
 0xb6d   :  { %1086 = vmatpush1.msra.mxu1 %v2857_v18 }
 0xb6e   :  { %1087 = vmatprep.subr.mxu1 %v2862_v19 }
 0xb6f   :  { %1088 = vmatpush1.msra.mxu1 %v2866_v20 }
 0xb70   :  { %1089 = vmatprep.subr.mxu1 %v2876_v23 }
 0xb71   :  { %1090 = vmatpush1.msra.mxu1 %v2880_v24 }
 0xb72   :  { %1091 = vmatprep.subr.mxu1 %v2884_v25 }
 0xb73   :  { %1092 = vmatpush1.msra.mxu1 %v2888_v26 }
 0xb74   :  { %1093 = vmatprep.subr.mxu1 %v2898_v29 }
 0xb75   :  { %1094 = vmatpush1.msra.mxu1 %v2902_v30 }
 0xb76   :  { %1095 = vmatprep.subr.mxu1 %v2906_v31 }
 0xb77   :  { %1096 = vmatpush1.msra.mxu1 %v2910_v32 }
 0xc28   :  { %v903_v12 = vpop.f32.mrf.mxu1 }
 0xc29   :  { %v908_v13 = vadd.f32 %v903_v12, %v832_v6 }
 0xc2a   :  { %v905_v14 = vpop.f32.mrf.mxu1 }
 0xc2b   :  { %v909_v17 = vadd.f32 %v905_v14, %v833_v22  ;;  %v2479_v19 = vmul.f32 -1.442695, %v908_v13  ;;  %v1187_v14 = vld [vmem:[#allocation5 + $0x108] sm:$0xff] }
 0xc2d   :  { %2644 = vtanh.f32 %v909_v17  ;;  %v2480_v54 = vmul.f32 -1.442695, %v909_v17  ;;  %v1186_v17 = vld [vmem:[#allocation5 + $0x100] sm:$0xff] }
 0xc2e   :  { %2646 = vpow2.f32 %v2479_v19  ;;  %v1184_v19 = vld [vmem:[#allocation5 + $0xf0] sm:$0xff] }
 0xc3a   :  { %v2645_v18 = vpop.eup %2644 }
 0xc3b   :  { %925 = vrot.lane.b32.xlu1 %v2645_v18, %s2802_s0  ;;  %v2647_v20 = vpop.eup %2646  ;;  %v1185_v18 = vld [vmem:[#allocation5 + $0xf8] sm:$0xff] }
 0xc3c   :  { %v916_v23 = vadd.f32 1.0, %v2647_v20  ;;  %v1183_v20 = vld [vmem:[#allocation5 + $0xe8] sm:$0xff] }
 0xc3e   :  { %2648 = vrcp.f32 %v916_v23  ;;  %v1182_v23 = vld [vmem:[#allocation5 + $0xe0] sm:$0xff] }
 0xc4b   :  { %v2649_v24 = vpop.eup %2648 }
 0xc4c   :  { %v923_v29 = vmul.f32 %v2649_v24, %v819_v61 }
 0xcad   :  { %v926_v25 = vpop.permute.xlu1 %925 }
 0xcae   :  { %v928_v26 = vmul.f32 %v2649_v24, %v926_v25  ;;  %v1181_v24 = vld [vmem:[#allocation5 + $0xd8] sm:$0xff]  ;;  %v1180_v25 = vld [vmem:[#allocation5 + $0xd0] sm:$0xff] }
 0xcb0   :  { %930 = vrot.lane.b32.xlu0 %v928_v26, %s2802_s0  ;;  %v1179_v26 = vld [vmem:[#allocation5 + $0xc8] sm:$0xff] }
 0xd22   :  { %v931_v30 = vpop.permute.xlu0 %930 }
 0xd23   :  { %v933_v31 = vadd.f32 %v931_v30, %v923_v29  ;;  %v1178_v29 = vld [vmem:[#allocation5 + $0xc0] sm:$0xff] }
 0xd25   :  { %2650 = vtanh.f32 %v933_v31 }
 0xd26   :  { %2652 = vpow2.f32 %v2480_v54  ;;  %v3274_v54 = vld [vmem:[#allocation5 + $0x1a8] sm:$0xff] }
 0xd32   :  { %v2651_v32 = vpop.eup %2650 }
 0xd33   :  { %936 = vrot.lane.b32.xlu1 %v2651_v32, %s2802_s0  ;;  %v2653_v58 = vpop.eup %2652  ;;  %v3270_v32 = vld [vmem:[#allocation5 + $0x1b0] sm:$0xff] }
 0xd34   :  { %v917_v60 = vadd.f32 1.0, %v2653_v58  ;;  %v3277_v58 = vld [vmem:[#allocation5 + $0x1a0] sm:$0xff] }
 0xd36   :  { %2654 = vrcp.f32 %v917_v60  ;;  %v3280_v60 = vld [vmem:[#allocation5 + $0x198] sm:$0xff] }
 0xd43   :  { %v2655_v3 = vpop.eup %2654 }
 0xda5   :  { %v937_v6 = vpop.permute.xlu1 %936 }
 0xda6   :  { %v939_v22 = vmul.f32 %v2655_v3, %v937_v6  ;;  %v3283_v3 = vld [vmem:[#allocation5 + $0x190] sm:$0xff]  ;;  %v3286_v6 = vld [vmem:[#allocation5 + $0x188] sm:$0xff] }
 0xda8   :  { %940 = vst.msk [vmem:[#allocation3 + $0x28] sm:$0xff] %vm86_vm0, %v939_v22  ;;  %2481 = vmatmul.mubr.msk.f32.vlgmr.msra.gmra.mxu0 %vm262_vm4, %v939_v22 }
 0xda9   :  { %941 = vst.msk [vmem:[#allocation3 + $0x10] sm:$0xff] %vm370_vm3, %v939_v22  ;;  %1295 = vmatprep.mubr.f32.mxu0 %v2801_v0  ;;  %1248 = vmatpush1.msra.mxu0 %v1192_v50  ;;  %v3289_v22 = vld [vmem:[#allocation5 + $0x180] sm:$0xff] }
 0xdaa   :  { %1249 = vmatprep.subr.mxu0 %v1191_v27 }
 0xdab   :  { %1250 = vmatpush1.msra.mxu0 %v1190_v46 }
 0xe68   :  { %v1017_v21 = vpop.f32.mrf.mxu0 }
 0xe69   :  { %v1022_v35 = vadd.f32 %v1017_v21, %v946_v10  ;;  %v3292_v21 = vld [vmem:[#allocation5 + $0x178] sm:$0xff] }
 0xe6a   :  { %v1019_v42 = vpop.f32.mrf.mxu0 }
 0xe6b   :  { %v1023_v59 = vadd.f32 %v1019_v42, %v947_v39  ;;  %v2482_v16 = vmul.f32 -1.442695, %v1022_v35  ;;  %v3295_v35 = vld [vmem:[#allocation5 + $0x170] sm:$0xff]  ;;  %v3298_v42 = vld [vmem:[#allocation5 + $0x168] sm:$0xff] }
 0xe6d   :  { %2656 = vtanh.f32 %v1023_v59  ;;  %v2483_v7 = vmul.f32 -1.442695, %v1023_v59  ;;  %v3301_v59 = vld [vmem:[#allocation5 + $0x160] sm:$0xff] }
 0xe6e   :  { %2658 = vpow2.f32 %v2482_v16  ;;  %v3307_v16 = vld [vmem:[#allocation5 + $0x150] sm:$0xff] }
 0xe7a   :  { %v2657_v53 = vpop.eup %2656 }
 0xe7b   :  { %1039 = vrot.lane.b32.xlu0 %v2657_v53, %s2802_s0  ;;  %v2659_v47 = vpop.eup %2658  ;;  %v3304_v53 = vld [vmem:[#allocation5 + $0x158] sm:$0xff] }
 0xe7c   :  { %v1030_v2 = vadd.f32 1.0, %v2659_v47  ;;  %v3310_v47 = vld [vmem:[#allocation5 + $0x148] sm:$0xff] }
 0xe7e   :  { %2660 = vrcp.f32 %v1030_v2  ;;  %v3313_v2 = vld [vmem:[#allocation5 + $0x140] sm:$0xff] }
 0xe8b   :  { %v2661_v4 = vpop.eup %2660 }
 0xe8c   :  { %v1037_v1 = vmul.f32 %v2661_v4, %v933_v31  ;;  %v3267_v31 = vld [vmem:[#allocation5 + $0x1b8] sm:$0xff] }
 0xe8d   :  { %1398 = vmatprep.subr.mxu1 %v3267_v31 }
 0xeed   :  { %v1040_v9 = vpop.permute.xlu0 %1039 }
 0xeee   :  { %v1042_v51 = vmul.f32 %v2661_v4, %v1040_v9 }
 0xef0   :  { %1044 = vrot.lane.b32.xlu1 %v1042_v51, %s2802_s0 }
 0xf62   :  { %v1045_v10 = vpop.permute.xlu1 %1044 }
 0xf63   :  { %v1047_v8 = vadd.f32 %v1045_v10, %v1037_v1 }
 0xf65   :  { %2662 = vtanh.f32 %v1047_v8 }
 0xf66   :  { %2664 = vpow2.f32 %v2483_v7 }
 0xf72   :  { %v2663_v63 = vpop.eup %2662 }
 0xf73   :  { %1050 = vrot.lane.b32.xlu0 %v2663_v63, %s2802_s0  ;;  %v2665_v39 = vpop.eup %2664 }
 0xf74   :  { %v1031_v37 = vadd.f32 1.0, %v2665_v39  ;;  %v1172_v39 = vld [vmem:[#allocation3 + $0x10] sm:$0xff] }
 0xf76   :  { %2666 = vrcp.f32 %v1031_v37  ;;  %v1173_v37 = vld [vmem:[#allocation3 + $0x18] sm:$0xff] }
 0xf83   :  { %v2667_v11 = vpop.eup %2666 }
 0xfe5   :  { %v1051_v36 = vpop.permute.xlu0 %1050 }
 0xfe6   :  { %v1053_v33 = vmul.f32 %v2667_v11, %v1051_v36  ;;  %v1174_v11 = vld [vmem:[#allocation3 + $0x20] sm:$0xff]  ;;  %v1175_v36 = vld [vmem:[#allocation3 + $0x28] sm:$0xff] }
 0xfe8   :  { %1054 = vst.msk [vmem:[#allocation3 + $0x30] sm:$0xff] %vm86_vm0, %v1053_v33  ;;  %2484 = vmatmul.mubr.msk.f32.vlgmr.msra.gmra.mxu1 %vm262_vm4, %v1053_v33 }
 0xfe9   :  { %1055 = vst.msk [vmem:[#allocation3 + $0x8] sm:$0xff] %vm370_vm3, %v1053_v33  ;;  %1446 = vmatprep.mubr.f32.mxu1 %v2801_v0  ;;  %1399 = vmatpush1.msra.mxu1 %v3270_v32 }
 0xfea   :  { %1400 = vmatprep.subr.mxu1 %v3274_v54 }
 0xfeb   :  { %1401 = vmatpush1.msra.mxu1 %v3277_v58 }
 0xfec   :  { %1402 = vmatprep.subr.mxu1 %v3280_v60 }
 0xfed   :  { %1403 = vmatpush1.msra.mxu1 %v3283_v3 }
 0xfee   :  { %1404 = vmatprep.subr.mxu1 %v3286_v6 }
 0xfef   :  { %1405 = vmatpush1.msra.mxu1 %v3289_v22  ;;  %v1176_v33 = vld [vmem:[#allocation3 + $0x30] sm:$0xff] }
 0xff0   :  { %1406 = vmatprep.subr.mxu1 %v3292_v21  ;;  %v1171_v7 = vld [vmem:[#allocation3 + $0x8] sm:$0xff] }
 0xff1   :  { %1407 = vmatpush1.msra.mxu1 %v3295_v35 }
 0xff2   :  { %1408 = vmatprep.subr.mxu1 %v3298_v42 }
 0xff3   :  { %1409 = vmatpush1.msra.mxu1 %v3301_v59 }
 0xff4   :  { %1410 = vmatprep.subr.mxu1 %v3304_v53 }
 0xff5   :  { %1411 = vmatpush1.msra.mxu1 %v3307_v16 }
 0xff6   :  { %1412 = vmatprep.subr.mxu1 %v3310_v47 }
 0xff7   :  { %1413 = vmatpush1.msra.mxu1 %v3313_v2 }
 0xff8   :  { %1447 = vmatmul.mubr.f32.vlgmr.msra.gmra.mxu1 %v2801_v0  ;;  %1512 = vmatprep.subr.mxu1 %v3267_v31 }
 0xff9   :  { %1513 = vmatpush1.msra.mxu1 %v3270_v32  ;;  %1560 = vmatprep.mubr.f32.mxu1 %v2801_v0 }
 0xffa   :  { %1514 = vmatprep.subr.mxu1 %v3274_v54 }
 0xffb   :  { %1515 = vmatpush1.msra.mxu1 %v3277_v58 }
 0xffc   :  { %1516 = vmatprep.subr.mxu1 %v3280_v60 }
 0xffd   :  { %1517 = vmatpush1.msra.mxu1 %v3283_v3 }
 0xffe   :  { %1518 = vmatprep.subr.mxu1 %v3286_v6 }
 0xfff   :  { %1519 = vmatpush1.msra.mxu1 %v3289_v22 }
0x1000   :  { %1520 = vmatprep.subr.mxu1 %v3292_v21 }
0x1001   :  { %1521 = vmatpush1.msra.mxu1 %v3295_v35 }
0x1002   :  { %1522 = vmatprep.subr.mxu1 %v3298_v42 }
0x1003   :  { %1523 = vmatpush1.msra.mxu1 %v3301_v59 }
0x1004   :  { %1524 = vmatprep.subr.mxu1 %v3304_v53 }
0x1005   :  { %1525 = vmatpush1.msra.mxu1 %v3307_v16 }
0x1006   :  { %1526 = vmatprep.subr.mxu1 %v3310_v47 }
0x1007   :  { %1527 = vmatpush1.msra.mxu1 %v3313_v2 }
0x1008   :  { %1740 = vmatprep.subr.mxu1 %v3267_v31 }
0x10a8   :  { %v1131_v5 = vpop.f32.mrf.mxu1 }
0x10a9   :  { %v1136_v44 = vadd.f32 %v1131_v5, %v1060_v49 }
0x10aa   :  { %v1133_v15 = vpop.f32.mrf.mxu1 }
0x10ab   :  { %v3261_v45 = vadd.f32 %v1133_v15, %v1061_v56  ;;  %v2485_v48 = vmul.f32 -1.442695, %v1136_v44  ;;  %v1189_v56 = vld [vmem:[#allocation5 + $0x118] sm:$0xff] }
0x10ac   :  { %1251 = vmatprep.subr.mxu0 %v1189_v56  ;;  %v1195_v44 = vld [vmem:[#allocation5 + $0x1d0] ss:$8 sm:$0x3] }
0x10ad   :  { %2668 = vtanh.f32 %v3261_v45  ;;  %1252 = vmatpush1.msra.mxu0 %v1188_v55  ;;  %v2486_v4 = vmul.f32 -1.442695, %v3261_v45 }
0x10ae   :  { %2670 = vpow2.f32 %v2485_v48  ;;  %1253 = vmatprep.subr.mxu0 %v1187_v14 }
0x10af   :  { %1254 = vmatpush1.msra.mxu0 %v1186_v17 }
0x10b0   :  { %1255 = vmatprep.subr.mxu0 %v1185_v18 }
0x10b1   :  { %1256 = vmatpush1.msra.mxu0 %v1184_v19 }
0x10b2   :  { %1257 = vmatprep.subr.mxu0 %v1183_v20 }
0x10b3   :  { %1258 = vmatpush1.msra.mxu0 %v1182_v23 }
0x10b4   :  { %1259 = vmatprep.subr.mxu0 %v1181_v24 }
0x10b5   :  { %1260 = vmatpush1.msra.mxu0 %v1180_v25 }
0x10b6   :  { %1261 = vmatprep.subr.mxu0 %v1179_v26 }
0x10b7   :  { %1262 = vmatpush1.msra.mxu0 %v1178_v29 }
0x10b8   :  { %1626 = vmatprep.subr.mxu0 %v3267_v31 }
0x10ba   :  { %v2669_v61 = vpop.eup %2668 }
0x10bb   :  { %1153 = vrot.lane.b32.xlu1 %v2669_v61, %s2802_s0  ;;  %v2671_v41 = vpop.eup %2670  ;;  %v3742_v61 = vsub.s32 0, %v2952_v34 }
0x10bc   :  { %v1144_v40 = vadd.f32 1.0, %v2671_v41 }
0x10bd   :  { %v1200_v48 = vrot.slane %v1195_v44, %v3742_v61 }
0x10be   :  { %2672 = vrcp.f32 %v1144_v40  ;;  %v3743_v40 = vsub.s32 1, %v2952_v34 }
0x10cb   :  { %v2673_v43 = vpop.eup %2672 }
0x10cc   :  { %v1151_v52 = vmul.f32 %v2673_v43, %v1047_v8 }
0x112d   :  { %v1154_v28 = vpop.permute.xlu1 %1153 }
0x112e   :  { %v1156_v49 = vmul.f32 %v2673_v43, %v1154_v28  ;;  %v1204_v43 = vrot.slane %v1195_v44, %v3743_v40 }
0x1130   :  { %1158 = vrot.lane.b32.xlu0 %v1156_v49, %s2802_s0 }
0x11a2   :  { %v1159_v12 = vpop.permute.xlu0 %1158 }
0x11a3   :  { %v1161_v13 = vadd.f32 %v1159_v12, %v1151_v52 }
0x11a5   :  { %2674 = vtanh.f32 %v1161_v13 }
0x11a6   :  { %2676 = vpow2.f32 %v2486_v4 }
0x11b2   :  { %v2675_v30 = vpop.eup %2674 }
0x11b3   :  { %1164 = vrot.lane.b32.xlu1 %v2675_v30, %s2802_s0  ;;  %v2677_v9 = vpop.eup %2676 }
0x11b4   :  { %v1145_v51 = vadd.f32 1.0, %v2677_v9 }
0x11b6   :  { %2678 = vrcp.f32 %v1145_v51 }
0x11c3   :  { %v2679_v1 = vpop.eup %2678 }
0x1225   :  { %v1165_v10 = vpop.permute.xlu1 %1164 }
0x1226   :  { %v1167_v8 = vmul.f32 %v2679_v1, %v1165_v10 }
0x1228   :  { %1168 = vst.msk [vmem:[#allocation3 + $0x38] sm:$0xff] %vm86_vm0, %v1167_v8 }
0x1229   :  { %1169 = vst.msk [vmem:[#allocation3] sm:$0xff] %vm370_vm3, %v1167_v8 }
0x122f   :  { %v1177_v5 = vld [vmem:[#allocation3 + $0x38] sm:$0xff] }
0x1230   :  { %v1170_v63 = vld [vmem:[#allocation3] sm:$0xff] }
0x1231   :  { %2487 = vmatmul.mubr.msk.f32.vlgmr.msra.gmra.mxu0 %vm262_vm4, %v1170_v63 }
0x1232   :  { %1301 = vmatprep.mubr.f32.mxu0 %v2801_v0  ;;  %1627 = vmatpush1.msra.mxu0 %v3270_v32 }
0x1233   :  { %1628 = vmatprep.subr.mxu0 %v3274_v54 }
0x1234   :  { %1629 = vmatpush1.msra.mxu0 %v3277_v58 }
0x1235   :  { %2488 = vmatmul.mubr.msk.f32.gmra.mxu0 %vm262_vm4, %v1171_v7  ;;  %1630 = vmatprep.subr.mxu0 %v3280_v60 }
0x1236   :  { %1307 = vmatprep.mubr.f32.mxu0 %v2801_v0  ;;  %1631 = vmatpush1.msra.mxu0 %v3283_v3 }
0x1237   :  { %1632 = vmatprep.subr.mxu0 %v3286_v6 }
0x1238   :  { %1633 = vmatpush1.msra.mxu0 %v3289_v22 }
0x1239   :  { %2489 = vmatmul.mubr.msk.f32.gmra.mxu0 %vm262_vm4, %v1172_v39  ;;  %1634 = vmatprep.subr.mxu0 %v3292_v21 }
0x123a   :  { %1313 = vmatprep.mubr.f32.mxu0 %v2801_v0  ;;  %1635 = vmatpush1.msra.mxu0 %v3295_v35 }
0x123b   :  { %1636 = vmatprep.subr.mxu0 %v3298_v42 }
0x123c   :  { %1637 = vmatpush1.msra.mxu0 %v3301_v59 }
0x123d   :  { %2490 = vmatmul.mubr.msk.f32.gmra.mxu0 %vm262_vm4, %v1173_v37  ;;  %1638 = vmatprep.subr.mxu0 %v3304_v53 }
0x123e   :  { %1319 = vmatprep.mubr.f32.mxu0 %v2801_v0  ;;  %1639 = vmatpush1.msra.mxu0 %v3307_v16 }
0x123f   :  { %1640 = vmatprep.subr.mxu0 %v3310_v47 }
0x1240   :  { %1641 = vmatpush1.msra.mxu0 %v3313_v2 }
0x1241   :  { %2491 = vmatmul.mubr.msk.f32.gmra.mxu0 %vm262_vm4, %v1174_v11  ;;  %1854 = vmatprep.subr.mxu0 %v3267_v31 }
0x1242   :  { %1325 = vmatprep.mubr.f32.mxu0 %v2801_v0 }
0x1245   :  { %2492 = vmatmul.mubr.msk.f32.gmra.mxu0 %vm262_vm4, %v1175_v36 }
0x1246   :  { %1331 = vmatprep.mubr.f32.mxu0 %v2801_v0 }
0x1249   :  { %2493 = vmatmul.mubr.msk.f32.gmra.mxu0 %vm262_vm4, %v1176_v33 }
0x124a   :  { %1337 = vmatprep.mubr.f32.mxu0 %v2801_v0 }
0x124d   :  { %2494 = vmatmul.mubr.msk.f32.gmra.mxu0 %vm262_vm4, %v1177_v5  ;;  %v1448_v5 = vpop.f32.mrf.mxu1 }
0x124e   :  { %1674 = vmatprep.mubr.f32.mxu0 %v2801_v0 }
0x12f1   :  { %v1297_v15 = vpop.f32.mrf.mxu0 }
0x12f2   :  { %v3438_v36 = vadd.f32 %v1297_v15, %v1200_v48 }
0x12f3   :  { %v1299_v45 = vpop.f32.mrf.mxu0 }
0x12f4   :  { %v3450_v40 = vadd.f32 %v1299_v45, %v1204_v43 }
0x12f5   :  { %v1303_v41 = vpop.f32.mrf.mxu0 }
0x12f6   :  { %v3374_v28 = vadd.f32 %v1303_v41, %v1200_v48 }
0x12f7   :  { %v1305_v49 = vpop.f32.mrf.mxu0 }
0x12f8   :  { %v3376_v38 = vadd.f32 %v1305_v49, %v1204_v43 }
0x12f9   :  { %v1309_v50 = vpop.f32.mrf.mxu0 }
0x12fa   :  { %v3378_v27 = vadd.f32 %v1309_v50, %v1200_v48 }
0x12fb   :  { %v1311_v46 = vpop.f32.mrf.mxu0 }
0x12fc   :  { %v3380_v56 = vadd.f32 %v1311_v46, %v1204_v43  ;;  %v1450_v46 = vpop.f32.mrf.mxu1 }
0x12fd   :  { %v1315_v55 = vpop.f32.mrf.mxu0 }
0x12fe   :  { %v3382_v52 = vadd.f32 %v1315_v55, %v1200_v48 }
0x12ff   :  { %v1317_v12 = vpop.f32.mrf.mxu0 }
0x1300   :  { %v3384_v13 = vadd.f32 %v1317_v12, %v1204_v43 }
0x1301   :  { %v1321_v14 = vpop.f32.mrf.mxu0 }
0x1302   :  { %v3386_v34 = vadd.f32 %v1321_v14, %v1200_v48 }
0x1303   :  { %v1323_v17 = vpop.f32.mrf.mxu0 }
0x1304   :  { %v3388_v18 = vadd.f32 %v1323_v17, %v1204_v43  ;;  %v1719_v19 = vsel %vm2970_vm1, %v3382_v52, %v3386_v34  ;;  %v1833_v20 = vsel %vm2970_vm1, %v3386_v34, %v3382_v52 }
0x1305   :  { %v1327_v23 = vpop.f32.mrf.mxu0 }
0x1306   :  { %v3398_v24 = vadd.f32 %v1327_v23, %v1200_v48  ;;  %v1720_v25 = vsel %vm2978_vm2, %v3384_v13, %v3388_v18  ;;  %v1834_v26 = vsel %vm2978_vm2, %v3388_v18, %v3384_v13 }
0x1307   :  { %v1329_v29 = vpop.f32.mrf.mxu0 }
0x1308   :  { %v3408_v30 = vadd.f32 %v1329_v29, %v1204_v43  ;;  %v1605_v4 = vsel %vm2970_vm1, %v3378_v27, %v3398_v24  ;;  %v1947_v9 = vsel %vm2970_vm1, %v3398_v24, %v3378_v27 }
0x1309   :  { %v1333_v51 = vpop.f32.mrf.mxu0 }
0x130a   :  { %v3418_v1 = vadd.f32 %v1333_v51, %v1200_v48  ;;  %v1606_v10 = vsel %vm2978_vm2, %v3380_v56, %v3408_v30  ;;  %v1948_v8 = vsel %vm2978_vm2, %v3408_v30, %v3380_v56 }
0x130b   :  { %v1335_v63 = vpop.f32.mrf.mxu0 }
0x130c   :  { %v3428_v7 = vadd.f32 %v1335_v63, %v1204_v43  ;;  %v1491_v39 = vsel %vm2970_vm1, %v3374_v28, %v3418_v1  ;;  %v2061_v37 = vsel %vm2970_vm1, %v3418_v1, %v3374_v28 }
0x130d   :  { %v1339_v11 = vpop.f32.mrf.mxu0 }
0x130e   :  { %v3440_v33 = vadd.f32 %v1339_v11, %v1200_v48  ;;  %v1492_v44 = vsel %vm2978_vm2, %v3376_v38, %v3428_v7  ;;  %v2062_v61 = vsel %vm2978_vm2, %v3428_v7, %v3376_v38 }
0x130f   :  { %v1341_v41 = vpop.f32.mrf.mxu0 }
0x1310   :  { %v3452_v49 = vadd.f32 %v1341_v41, %v1204_v43  ;;  %v1380_v15 = vsel %vm2970_vm1, %v3438_v36, %v3440_v33 }
0x1311   :  { %v1453_v12 = vadd.f32 %v1448_v5, %v1380_v15 }
0x1312   :  { %v1381_v50 = vsel %vm2978_vm2, %v3450_v40, %v3452_v49  ;;  %v2176_v45 = vsel %vm2978_vm2, %v3452_v49, %v3450_v40  ;;  %v2298_v40 = vld [vmem:[%s3734_s2 + $0x28] sm:$0xff] }
0x1313   :  { %v1454_v43 = vadd.f32 %v1450_v46, %v1381_v50  ;;  %v2495_v14 = vmul.f32 -1.442695, %v1453_v12 }
0x1315   :  { %2680 = vtanh.f32 %v1454_v43  ;;  %v2496_v46 = vmul.f32 -1.442695, %v1454_v43 }
0x1316   :  { %2682 = vpow2.f32 %v2495_v14 }
0x1322   :  { %v2681_v55 = vpop.eup %2680 }
0x1323   :  { %1470 = vrot.lane.b32.xlu0 %v2681_v55, %s2802_s0  ;;  %v2683_v17 = vpop.eup %2682 }
0x1324   :  { %v1461_v23 = vadd.f32 1.0, %v2683_v17 }
0x1326   :  { %2684 = vrcp.f32 %v1461_v23 }
0x1333   :  { %v2685_v29 = vpop.eup %2684 }
0x1334   :  { %v1468_v11 = vmul.f32 0.0, %v2685_v29 }
0x1395   :  { %v1471_v51 = vpop.permute.xlu0 %1470 }
0x1396   :  { %v1473_v63 = vmul.f32 %v2685_v29, %v1471_v51 }
0x1398   :  { %1475 = vrot.lane.b32.xlu1 %v1473_v63, %s2802_s0 }
0x140a   :  { %v1476_v41 = vpop.permute.xlu1 %1475 }
0x140b   :  { %v1478_v48 = vadd.f32 %v1476_v41, %v1468_v11 }
0x140d   :  { %2686 = vtanh.f32 %v1478_v48 }
0x140e   :  { %2688 = vpow2.f32 %v2496_v46 }
0x141a   :  { %v2687_v50 = vpop.eup %2686 }
0x141b   :  { %1481 = vrot.lane.b32.xlu0 %v2687_v50, %s2802_s0  ;;  %v2689_v5 = vpop.eup %2688 }
0x141c   :  { %v1462_v15 = vadd.f32 1.0, %v2689_v5 }
0x141e   :  { %2690 = vrcp.f32 %v1462_v15 }
0x142b   :  { %v2691_v55 = vpop.eup %2690 }
0x148d   :  { %v1482_v12 = vpop.permute.xlu0 %1481 }
0x148e   :  { %v1484_v14 = vmul.f32 %v2691_v55, %v1482_v12 }
0x1490   :  { %1485 = vst.msk [vmem:[#allocation4] sm:$0xff] %vm86_vm0, %v1484_v14  ;;  %2497 = vmatmul.mubr.msk.f32.vlgmr.msra.gmra.mxu1 %vm262_vm4, %v1484_v14 }
0x1491   :  { %1486 = vst.msk [vmem:[#allocation4 + $0x38] sm:$0xff] %vm370_vm3, %v1484_v14  ;;  %1741 = vmatpush1.msra.mxu1 %v3270_v32  ;;  %1788 = vmatprep.mubr.f32.mxu1 %v2801_v0 }
0x1492   :  { %1742 = vmatprep.subr.mxu1 %v3274_v54 }
0x1493   :  { %1743 = vmatpush1.msra.mxu1 %v3277_v58 }
0x1494   :  { %1744 = vmatprep.subr.mxu1 %v3280_v60 }
0x1495   :  { %1745 = vmatpush1.msra.mxu1 %v3283_v3 }
0x1496   :  { %1746 = vmatprep.subr.mxu1 %v3286_v6 }
0x1497   :  { %1747 = vmatpush1.msra.mxu1 %v3289_v22 }
0x1498   :  { %1748 = vmatprep.subr.mxu1 %v3292_v21 }
0x1499   :  { %1749 = vmatpush1.msra.mxu1 %v3295_v35 }
0x149a   :  { %1750 = vmatprep.subr.mxu1 %v3298_v42 }
0x149b   :  { %1751 = vmatpush1.msra.mxu1 %v3301_v59 }
0x149c   :  { %1752 = vmatprep.subr.mxu1 %v3304_v53 }
0x149d   :  { %1753 = vmatpush1.msra.mxu1 %v3307_v16 }
0x149e   :  { %1754 = vmatprep.subr.mxu1 %v3310_v47 }
0x149f   :  { %1755 = vmatpush1.msra.mxu1 %v3313_v2 }
0x14a0   :  { %1968 = vmatprep.subr.mxu1 %v3267_v31 }
0x1550   :  { %v1562_v43 = vpop.f32.mrf.mxu1 }
0x1551   :  { %v1567_v17 = vadd.f32 %v1562_v43, %v1491_v39 }
0x1552   :  { %v1564_v23 = vpop.f32.mrf.mxu1 }
0x1553   :  { %v1568_v29 = vadd.f32 %v1564_v23, %v1492_v44  ;;  %v2498_v63 = vmul.f32 -1.442695, %v1567_v17 }
0x1555   :  { %2692 = vtanh.f32 %v1568_v29  ;;  %v2499_v44 = vmul.f32 -1.442695, %v1568_v29 }
0x1556   :  { %2694 = vpow2.f32 %v2498_v63 }
0x1562   :  { %v2693_v51 = vpop.eup %2692 }
0x1563   :  { %1584 = vrot.lane.b32.xlu1 %v2693_v51, %s2802_s0  ;;  %v2695_v11 = vpop.eup %2694 }
0x1564   :  { %v1575_v41 = vadd.f32 1.0, %v2695_v11 }
0x1566   :  { %2696 = vrcp.f32 %v1575_v41 }
0x1573   :  { %v2697_v50 = vpop.eup %2696 }
0x1574   :  { %v1582_v15 = vmul.f32 %v2697_v50, %v1478_v48 }
0x15d5   :  { %v1585_v46 = vpop.permute.xlu1 %1584 }
0x15d6   :  { %v1587_v5 = vmul.f32 %v2697_v50, %v1585_v46 }
0x15d8   :  { %1589 = vrot.lane.b32.xlu0 %v1587_v5, %s2802_s0 }
0x164a   :  { %v1590_v55 = vpop.permute.xlu0 %1589 }
0x164b   :  { %v1592_v12 = vadd.f32 %v1590_v55, %v1582_v15 }
0x164d   :  { %2698 = vtanh.f32 %v1592_v12 }
0x164e   :  { %2700 = vpow2.f32 %v2499_v44 }
0x165a   :  { %v2699_v39 = vpop.eup %2698 }
0x165b   :  { %1595 = vrot.lane.b32.xlu1 %v2699_v39, %s2802_s0  ;;  %v2701_v14 = vpop.eup %2700 }
0x165c   :  { %v1576_v43 = vadd.f32 1.0, %v2701_v14 }
0x165e   :  { %2702 = vrcp.f32 %v1576_v43 }
0x166b   :  { %v2703_v17 = vpop.eup %2702 }
0x16cd   :  { %v1596_v23 = vpop.permute.xlu1 %1595 }
0x16ce   :  { %v1598_v51 = vmul.f32 %v2703_v17, %v1596_v23 }
0x16d0   :  { %1599 = vst.msk [vmem:[#allocation4 + $0x8] sm:$0xff] %vm86_vm0, %v1598_v51  ;;  %2500 = vmatmul.mubr.msk.f32.vlgmr.msra.gmra.mxu0 %vm262_vm4, %v1598_v51 }
0x16d1   :  { %1600 = vst.msk [vmem:[#allocation4 + $0x30] sm:$0xff] %vm370_vm3, %v1598_v51  ;;  %1855 = vmatpush1.msra.mxu0 %v3270_v32  ;;  %1902 = vmatprep.mubr.f32.mxu0 %v2801_v0 }
0x16d2   :  { %1856 = vmatprep.subr.mxu0 %v3274_v54 }
0x16d3   :  { %1857 = vmatpush1.msra.mxu0 %v3277_v58 }
0x16d4   :  { %1858 = vmatprep.subr.mxu0 %v3280_v60 }
0x16d5   :  { %1859 = vmatpush1.msra.mxu0 %v3283_v3 }
0x16d6   :  { %1860 = vmatprep.subr.mxu0 %v3286_v6 }
0x16d7   :  { %1861 = vmatpush1.msra.mxu0 %v3289_v22 }
0x16d8   :  { %1862 = vmatprep.subr.mxu0 %v3292_v21 }
0x16d9   :  { %1863 = vmatpush1.msra.mxu0 %v3295_v35 }
0x16da   :  { %1864 = vmatprep.subr.mxu0 %v3298_v42 }
0x16db   :  { %1865 = vmatpush1.msra.mxu0 %v3301_v59 }
0x16dc   :  { %1866 = vmatprep.subr.mxu0 %v3304_v53 }
0x16dd   :  { %1867 = vmatpush1.msra.mxu0 %v3307_v16 }
0x16de   :  { %1868 = vmatprep.subr.mxu0 %v3310_v47 }
0x16df   :  { %1869 = vmatpush1.msra.mxu0 %v3313_v2 }
0x16e0   :  { %2082 = vmatprep.subr.mxu0 %v3267_v31 }
0x1790   :  { %v1676_v48 = vpop.f32.mrf.mxu0 }
0x1791   :  { %v1681_v29 = vadd.f32 %v1676_v48, %v1605_v4 }
0x1792   :  { %v1678_v63 = vpop.f32.mrf.mxu0 }
0x1793   :  { %v1682_v11 = vadd.f32 %v1678_v63, %v1606_v10  ;;  %v2501_v50 = vmul.f32 -1.442695, %v1681_v29 }
0x1795   :  { %2704 = vtanh.f32 %v1682_v11  ;;  %v2502_v10 = vmul.f32 -1.442695, %v1682_v11 }
0x1796   :  { %2706 = vpow2.f32 %v2501_v50 }
0x17a2   :  { %v2705_v41 = vpop.eup %2704 }
0x17a3   :  { %1698 = vrot.lane.b32.xlu0 %v2705_v41, %s2802_s0  ;;  %v2707_v46 = vpop.eup %2706 }
0x17a4   :  { %v1689_v5 = vadd.f32 1.0, %v2707_v46 }
0x17a6   :  { %2708 = vrcp.f32 %v1689_v5 }
0x17b3   :  { %v2709_v15 = vpop.eup %2708 }
0x17b4   :  { %v1696_v4 = vmul.f32 %v2709_v15, %v1592_v12 }
0x1815   :  { %v1699_v55 = vpop.permute.xlu0 %1698 }
0x1816   :  { %v1701_v39 = vmul.f32 %v2709_v15, %v1699_v55 }
0x1818   :  { %1703 = vrot.lane.b32.xlu1 %v1701_v39, %s2802_s0 }
0x188a   :  { %v1704_v44 = vpop.permute.xlu1 %1703 }
0x188b   :  { %v1706_v14 = vadd.f32 %v1704_v44, %v1696_v4 }
0x188d   :  { %2710 = vtanh.f32 %v1706_v14 }
0x188e   :  { %2712 = vpow2.f32 %v2502_v10 }
0x189a   :  { %v2711_v43 = vpop.eup %2710 }
0x189b   :  { %1709 = vrot.lane.b32.xlu0 %v2711_v43, %s2802_s0  ;;  %v2713_v17 = vpop.eup %2712 }
0x189c   :  { %v1690_v23 = vadd.f32 1.0, %v2713_v17 }
0x189e   :  { %2714 = vrcp.f32 %v1690_v23 }
0x18ab   :  { %v2715_v51 = vpop.eup %2714 }
0x190d   :  { %v1710_v48 = vpop.permute.xlu0 %1709 }
0x190e   :  { %v1712_v29 = vmul.f32 %v2715_v51, %v1710_v48 }
0x1910   :  { %1713 = vst.msk [vmem:[#allocation4 + $0x10] sm:$0xff] %vm86_vm0, %v1712_v29  ;;  %2503 = vmatmul.mubr.msk.f32.vlgmr.msra.gmra.mxu1 %vm262_vm4, %v1712_v29 }
0x1911   :  { %1714 = vst.msk [vmem:[#allocation4 + $0x28] sm:$0xff] %vm370_vm3, %v1712_v29  ;;  %1969 = vmatpush1.msra.mxu1 %v3270_v32  ;;  %2016 = vmatprep.mubr.f32.mxu1 %v2801_v0 }
0x1912   :  { %1970 = vmatprep.subr.mxu1 %v3274_v54 }
0x1913   :  { %1971 = vmatpush1.msra.mxu1 %v3277_v58 }
0x1914   :  { %1972 = vmatprep.subr.mxu1 %v3280_v60 }
0x1915   :  { %1973 = vmatpush1.msra.mxu1 %v3283_v3 }
0x1916   :  { %1974 = vmatprep.subr.mxu1 %v3286_v6 }
0x1917   :  { %1975 = vmatpush1.msra.mxu1 %v3289_v22 }
0x1918   :  { %1976 = vmatprep.subr.mxu1 %v3292_v21 }
0x1919   :  { %1977 = vmatpush1.msra.mxu1 %v3295_v35 }
0x191a   :  { %1978 = vmatprep.subr.mxu1 %v3298_v42 }
0x191b   :  { %1979 = vmatpush1.msra.mxu1 %v3301_v59 }
0x191c   :  { %1980 = vmatprep.subr.mxu1 %v3304_v53 }
0x191d   :  { %1981 = vmatpush1.msra.mxu1 %v3307_v16 }
0x191e   :  { %1982 = vmatprep.subr.mxu1 %v3310_v47 }
0x191f   :  { %1983 = vmatpush1.msra.mxu1 %v3313_v2 }
0x1920   :  { %2196 = vmatprep.subr.mxu1 %v3267_v31 }
0x19d0   :  { %v1790_v12 = vpop.f32.mrf.mxu1 }
0x19d1   :  { %v1795_v63 = vadd.f32 %v1790_v12, %v1719_v19 }
0x19d2   :  { %v1792_v11 = vpop.f32.mrf.mxu1 }
0x19d3   :  { %v1796_v41 = vadd.f32 %v1792_v11, %v1720_v25  ;;  %v2504_v46 = vmul.f32 -1.442695, %v1795_v63 }
0x19d5   :  { %2716 = vtanh.f32 %v1796_v41  ;;  %v2505_v25 = vmul.f32 -1.442695, %v1796_v41 }
0x19d6   :  { %2718 = vpow2.f32 %v2504_v46 }
0x19e2   :  { %v2717_v50 = vpop.eup %2716 }
0x19e3   :  { %1812 = vrot.lane.b32.xlu1 %v2717_v50, %s2802_s0  ;;  %v2719_v31 = vpop.eup %2718 }
0x19e4   :  { %v1803_v5 = vadd.f32 1.0, %v2719_v31 }
0x19e6   :  { %2720 = vrcp.f32 %v1803_v5 }
0x19f3   :  { %v2721_v15 = vpop.eup %2720 }
0x19f4   :  { %v1810_v19 = vmul.f32 %v2721_v15, %v1706_v14 }
0x1a55   :  { %v1813_v55 = vpop.permute.xlu1 %1812 }
0x1a56   :  { %v1815_v39 = vmul.f32 %v2721_v15, %v1813_v55 }
0x1a58   :  { %1817 = vrot.lane.b32.xlu0 %v1815_v39, %s2802_s0 }
0x1aca   :  { %v1818_v4 = vpop.permute.xlu0 %1817 }
0x1acb   :  { %v1820_v44 = vadd.f32 %v1818_v4, %v1810_v19 }
0x1acd   :  { %2722 = vtanh.f32 %v1820_v44 }
0x1ace   :  { %2724 = vpow2.f32 %v2505_v25 }
0x1ada   :  { %v2723_v43 = vpop.eup %2722 }
0x1adb   :  { %1823 = vrot.lane.b32.xlu1 %v2723_v43, %s2802_s0  ;;  %v2725_v10 = vpop.eup %2724 }
0x1adc   :  { %v1804_v17 = vadd.f32 1.0, %v2725_v10 }
0x1ade   :  { %2726 = vrcp.f32 %v1804_v17 }
0x1aeb   :  { %v2727_v23 = vpop.eup %2726 }
0x1b4d   :  { %v1824_v51 = vpop.permute.xlu1 %1823 }
0x1b4e   :  { %v1826_v48 = vmul.f32 %v2727_v23, %v1824_v51 }
0x1b50   :  { %1827 = vst.msk [vmem:[#allocation4 + $0x18] sm:$0xff] %vm86_vm0, %v1826_v48  ;;  %2506 = vmatmul.mubr.msk.f32.vlgmr.msra.gmra.mxu0 %vm262_vm4, %v1826_v48 }
0x1b51   :  { %1828 = vst.msk [vmem:[#allocation4 + $0x20] sm:$0xff] %vm370_vm3, %v1826_v48  ;;  %2083 = vmatpush1.msra.mxu0 %v3270_v32  ;;  %2130 = vmatprep.mubr.f32.mxu0 %v2801_v0 }
0x1b52   :  { %2084 = vmatprep.subr.mxu0 %v3274_v54 }
0x1b53   :  { %2085 = vmatpush1.msra.mxu0 %v3277_v58 }
0x1b54   :  { %2086 = vmatprep.subr.mxu0 %v3280_v60 }
0x1b55   :  { %2087 = vmatpush1.msra.mxu0 %v3283_v3 }
0x1b56   :  { %2088 = vmatprep.subr.mxu0 %v3286_v6 }
0x1b57   :  { %2089 = vmatpush1.msra.mxu0 %v3289_v22 }
0x1b58   :  { %2090 = vmatprep.subr.mxu0 %v3292_v21 }
0x1b59   :  { %2091 = vmatpush1.msra.mxu0 %v3295_v35 }
0x1b5a   :  { %2092 = vmatprep.subr.mxu0 %v3298_v42 }
0x1b5b   :  { %2093 = vmatpush1.msra.mxu0 %v3301_v59 }
0x1b5c   :  { %2094 = vmatprep.subr.mxu0 %v3304_v53 }
0x1b5d   :  { %2095 = vmatpush1.msra.mxu0 %v3307_v16 }
0x1b5e   :  { %2096 = vmatprep.subr.mxu0 %v3310_v47 }
0x1b5f   :  { %2097 = vmatpush1.msra.mxu0 %v3313_v2 }
0x1b60   :  { %2543 = vmatprep.subr.mxu0 %v2300_v62 }
0x1c10   :  { %v1904_v14 = vpop.f32.mrf.mxu0 }
0x1c11   :  { %v1909_v29 = vadd.f32 %v1904_v14, %v1833_v20 }
0x1c12   :  { %v1906_v12 = vpop.f32.mrf.mxu0 }
0x1c13   :  { %v1910_v63 = vadd.f32 %v1906_v12, %v1834_v26  ;;  %v2507_v41 = vmul.f32 -1.442695, %v1909_v29 }
0x1c15   :  { %2728 = vtanh.f32 %v1910_v63  ;;  %v2508_v18 = vmul.f32 -1.442695, %v1910_v63 }
0x1c16   :  { %2730 = vpow2.f32 %v2507_v41 }
0x1c22   :  { %v2729_v11 = vpop.eup %2728 }
0x1c23   :  { %1926 = vrot.lane.b32.xlu0 %v2729_v11, %s2802_s0  ;;  %v2731_v50 = vpop.eup %2730 }
0x1c24   :  { %v1917_v46 = vadd.f32 1.0, %v2731_v50 }
0x1c26   :  { %2732 = vrcp.f32 %v1917_v46  ;;  %v3744_v46 = vsel %vm2970_vm1, %v3440_v33, %v3438_v36  ;;  %v2299_v33 = vld [vmem:[%s3734_s2 + $0x30] sm:$0xff] }
0x1c33   :  { %v2733_v31 = vpop.eup %2732 }
0x1c34   :  { %v1924_v34 = vmul.f32 %v2733_v31, %v1820_v44 }
0x1c95   :  { %v1927_v5 = vpop.permute.xlu0 %1926 }
0x1c96   :  { %v1929_v52 = vmul.f32 %v2733_v31, %v1927_v5 }
0x1c98   :  { %1931 = vrot.lane.b32.xlu1 %v1929_v52, %s2802_s0 }
0x1d0a   :  { %v1932_v20 = vpop.permute.xlu1 %1931 }
0x1d0b   :  { %v1934_v15 = vadd.f32 %v1932_v20, %v1924_v34 }
0x1d0d   :  { %2734 = vtanh.f32 %v1934_v15 }
0x1d0e   :  { %2736 = vpow2.f32 %v2508_v18 }
0x1d1a   :  { %v2735_v13 = vpop.eup %2734 }
0x1d1b   :  { %1937 = vrot.lane.b32.xlu0 %v2735_v13, %s2802_s0  ;;  %v2737_v26 = vpop.eup %2736 }
0x1d1c   :  { %v1918_v55 = vadd.f32 1.0, %v2737_v26 }
0x1d1e   :  { %2738 = vrcp.f32 %v1918_v55  ;;  %v2297_v55 = vld [vmem:[%s3734_s2 + $0x20] sm:$0xff] }
0x1d2b   :  { %v2739_v39 = vpop.eup %2738 }
0x1d8d   :  { %v1938_v19 = vpop.permute.xlu0 %1937 }
0x1d8e   :  { %v1940_v4 = vmul.f32 %v2739_v39, %v1938_v19  ;;  %v2296_v39 = vld [vmem:[%s3734_s2 + $0x18] sm:$0xff]  ;;  %v2295_v19 = vld [vmem:[%s3734_s2 + $0x10] sm:$0xff] }
0x1d90   :  { %1941 = vst.msk [vmem:[#allocation4 + $0x20] sm:$0xff] %vm86_vm0, %v1940_v4  ;;  %2509 = vmatmul.mubr.msk.f32.vlgmr.msra.gmra.mxu1 %vm262_vm4, %v1940_v4 }
0x1d91   :  { %1942 = vst.msk [vmem:[#allocation4 + $0x18] sm:$0xff] %vm370_vm3, %v1940_v4  ;;  %2197 = vmatpush1.msra.mxu1 %v3270_v32  ;;  %2244 = vmatprep.mubr.f32.mxu1 %v2801_v0  ;;  %v2294_v4 = vld [vmem:[%s3734_s2 + $0x8] sm:$0xff] }
0x1d92   :  { %2198 = vmatprep.subr.mxu1 %v3274_v54 }
0x1d93   :  { %2199 = vmatpush1.msra.mxu1 %v3277_v58 }
0x1d94   :  { %2200 = vmatprep.subr.mxu1 %v3280_v60 }
0x1d95   :  { %2201 = vmatpush1.msra.mxu1 %v3283_v3 }
0x1d96   :  { %2202 = vmatprep.subr.mxu1 %v3286_v6 }
0x1d97   :  { %2203 = vmatpush1.msra.mxu1 %v3289_v22 }
0x1d98   :  { %2204 = vmatprep.subr.mxu1 %v3292_v21 }
0x1d99   :  { %2205 = vmatpush1.msra.mxu1 %v3295_v35 }
0x1d9a   :  { %2206 = vmatprep.subr.mxu1 %v3298_v42 }
0x1d9b   :  { %2207 = vmatpush1.msra.mxu1 %v3301_v59 }
0x1d9c   :  { %2208 = vmatprep.subr.mxu1 %v3304_v53 }
0x1d9d   :  { %2209 = vmatpush1.msra.mxu1 %v3307_v16 }
0x1d9e   :  { %2210 = vmatprep.subr.mxu1 %v3310_v47 }
0x1d9f   :  { %2211 = vmatpush1.msra.mxu1 %v3313_v2 }
0x1e50   :  { %v2018_v0 = vpop.f32.mrf.mxu1 }
0x1e51   :  { %v2023_v32 = vadd.f32 %v2018_v0, %v1947_v9  ;;  %v2293_v0 = vld [vmem:[%s3734_s2] sm:$0xff] }
0x1e52   :  { %v2020_v54 = vpop.f32.mrf.mxu1 }
0x1e53   :  { %v2024_v58 = vadd.f32 %v2020_v54, %v1948_v8  ;;  %v2510_v3 = vmul.f32 -1.442695, %v2023_v32 }
0x1e55   :  { %2740 = vtanh.f32 %v2024_v58  ;;  %v2511_v2 = vmul.f32 -1.442695, %v2024_v58 }
0x1e56   :  { %2742 = vpow2.f32 %v2510_v3 }
0x1e62   :  { %v2741_v60 = vpop.eup %2740 }
0x1e63   :  { %2040 = vrot.lane.b32.xlu1 %v2741_v60, %s2802_s0  ;;  %v2743_v6 = vpop.eup %2742 }
0x1e64   :  { %v2031_v22 = vadd.f32 1.0, %v2743_v6 }
0x1e66   :  { %2744 = vrcp.f32 %v2031_v22 }
0x1e73   :  { %v2745_v21 = vpop.eup %2744 }
0x1e74   :  { %v2038_v59 = vmul.f32 %v2745_v21, %v1934_v15 }
0x1ed5   :  { %v2041_v35 = vpop.permute.xlu1 %2040 }
0x1ed6   :  { %v2043_v42 = vmul.f32 %v2745_v21, %v2041_v35 }
0x1ed8   :  { %2045 = vrot.lane.b32.xlu0 %v2043_v42, %s2802_s0 }
0x1f4a   :  { %v2046_v53 = vpop.permute.xlu0 %2045 }
0x1f4b   :  { %v2048_v16 = vadd.f32 %v2046_v53, %v2038_v59  ;;  %v2288_v59 = vld [vmem:[#allocation4 + $0x18] sm:$0xff]  ;;  %v2289_v53 = vld [vmem:[#allocation4 + $0x20] sm:$0xff] }
0x1f4d   :  { %2746 = vtanh.f32 %v2048_v16 }
0x1f4e   :  { %2748 = vpow2.f32 %v2511_v2 }
0x1f5a   :  { %v2747_v47 = vpop.eup %2746 }
0x1f5b   :  { %2051 = vrot.lane.b32.xlu1 %v2747_v47, %s2802_s0  ;;  %v2749_v27 = vpop.eup %2748 }
0x1f5c   :  { %v2032_v56 = vadd.f32 1.0, %v2749_v27  ;;  %v2518_v27 = vld [vmem:[%s3734_s2 + $0x40] ss:$0 sm:$0xff] }
0x1f5e   :  { %2750 = vrcp.f32 %v2032_v56 }
0x1f6b   :  { %v2751_v24 = vpop.eup %2750 }
0x1fcd   :  { %v2052_v30 = vpop.permute.xlu1 %2051 }
0x1fce   :  { %v2054_v9 = vmul.f32 %v2751_v24, %v2052_v30 }
0x1fd0   :  { %2055 = vst.msk [vmem:[#allocation4 + $0x28] sm:$0xff] %vm86_vm0, %v2054_v9  ;;  %2512 = vmatmul.mubr.msk.f32.vlgmr.msra.gmra.mxu0 %vm262_vm4, %v2054_v9 }
0x1fd1   :  { %2056 = vst.msk [vmem:[#allocation4 + $0x10] sm:$0xff] %vm370_vm3, %v2054_v9  ;;  %2544 = vmatpush3.msra.mxu0 %v2300_v62 }
0x1fd2   :  { %2545 = vmatprep.subr.mxu0 %v2299_v33 }
0x1fd3   :  { %2546 = vmatpush3.msra.mxu0 %v2299_v33 }
0x1fd4   :  { %2547 = vmatprep.subr.mxu0 %v2298_v40 }
0x1fd5   :  { %2548 = vmatpush3.msra.mxu0 %v2298_v40 }
0x1fd6   :  { %2549 = vmatprep.subr.mxu0 %v2297_v55 }
0x1fd7   :  { %2550 = vmatpush3.msra.mxu0 %v2297_v55 }
0x1fd8   :  { %2551 = vmatprep.subr.mxu0 %v2296_v39  ;;  %v2287_v42 = vld [vmem:[#allocation4 + $0x10] sm:$0xff] }
0x1fd9   :  { %2552 = vmatpush3.msra.mxu0 %v2296_v39 }
0x1fda   :  { %2553 = vmatprep.subr.mxu0 %v2295_v19 }
0x1fdb   :  { %2554 = vmatpush3.msra.mxu0 %v2295_v19 }
0x1fdc   :  { %2555 = vmatprep.subr.mxu0 %v2294_v4 }
0x1fdd   :  { %2556 = vmatpush3.msra.mxu0 %v2294_v4 }
0x1fde   :  { %2557 = vmatprep.subr.mxu0 %v2293_v0 }
0x1fdf   :  { %2558 = vmatpush3.msra.mxu0 %v2293_v0 }
0x2090   :  { %v2132_v8 = vpop.f32.mrf.mxu0 }
0x2091   :  { %v2137_v44 = vadd.f32 %v2132_v8, %v2061_v37 }
0x2092   :  { %v2134_v43 = vpop.f32.mrf.mxu0 }
0x2093   :  { %v2138_v25 = vadd.f32 %v2134_v43, %v2062_v61  ;;  %v2513_v17 = vmul.f32 -1.442695, %v2137_v44 }
0x2095   :  { %2752 = vtanh.f32 %v2138_v25  ;;  %v2514_v7 = vmul.f32 -1.442695, %v2138_v25 }
0x2096   :  { %2754 = vpow2.f32 %v2513_v17 }
0x20a2   :  { %v2753_v10 = vpop.eup %2752 }
0x20a3   :  { %2154 = vrot.lane.b32.xlu0 %v2753_v10, %s2802_s0  ;;  %v2755_v23 = vpop.eup %2754 }
0x20a4   :  { %v2145_v51 = vadd.f32 1.0, %v2755_v23 }
0x20a6   :  { %2756 = vrcp.f32 %v2145_v51 }
0x20b3   :  { %v2757_v48 = vpop.eup %2756 }
0x20b4   :  { %v2152_v1 = vmul.f32 %v2757_v48, %v2048_v16  ;;  %v2290_v16 = vld [vmem:[#allocation4 + $0x28] sm:$0xff] }
0x2115   :  { %v2155_v14 = vpop.permute.xlu0 %2154 }
0x2116   :  { %v2157_v28 = vmul.f32 %v2757_v48, %v2155_v14 }
0x2118   :  { %2159 = vrot.lane.b32.xlu1 %v2157_v28, %s2802_s0 }
0x218a   :  { %v2160_v37 = vpop.permute.xlu1 %2159 }
0x218b   :  { %v2162_v29 = vadd.f32 %v2160_v37, %v2152_v1 }
0x218d   :  { %2758 = vtanh.f32 %v2162_v29 }
0x218e   :  { %2760 = vpow2.f32 %v2514_v7 }
0x219a   :  { %v2759_v38 = vpop.eup %2758 }
0x219b   :  { %2165 = vrot.lane.b32.xlu0 %v2759_v38, %s2802_s0  ;;  %v2761_v61 = vpop.eup %2760 }
0x219c   :  { %v2146_v12 = vadd.f32 1.0, %v2761_v61 }
0x219e   :  { %2762 = vrcp.f32 %v2146_v12 }
0x21ab   :  { %v2763_v63 = vpop.eup %2762 }
0x220d   :  { %v2166_v11 = vpop.permute.xlu0 %2165 }
0x220e   :  { %v2168_v41 = vmul.f32 %v2763_v63, %v2166_v11 }
0x2210   :  { %2169 = vst.msk [vmem:[#allocation4 + $0x30] sm:$0xff] %vm86_vm0, %v2168_v41  ;;  %2515 = vmatmul.mubr.msk.f32.vlgmr.msra.gmra.mxu1 %vm262_vm4, %v2168_v41 }
0x2211   :  { %2170 = vst.msk [vmem:[#allocation4 + $0x8] sm:$0xff] %vm370_vm3, %v2168_v41 }
0x2217   :  { %v2291_v47 = vld [vmem:[#allocation4 + $0x30] sm:$0xff] }
0x2218   :  { %v2286_v35 = vld [vmem:[#allocation4 + $0x8] sm:$0xff] }
0x22d0   :  { %v2246_v50 = vpop.f32.mrf.mxu1 }
0x22d1   :  { %v2251_v31 = vadd.f32 %v2246_v50, %v3744_v46 }
0x22d2   :  { %v2248_v5 = vpop.f32.mrf.mxu1 }
0x22d3   :  { %v2252_v52 = vadd.f32 %v2248_v5, %v2176_v45  ;;  %v2516_v20 = vmul.f32 -1.442695, %v2251_v31 }
0x22d5   :  { %2764 = vtanh.f32 %v2252_v52  ;;  %v2517_v54 = vmul.f32 -1.442695, %v2252_v52 }
0x22d6   :  { %2766 = vpow2.f32 %v2516_v20 }
0x22e2   :  { %v2765_v34 = vpop.eup %2764 }
0x22e3   :  { %2268 = vrot.lane.b32.xlu1 %v2765_v34, %s2802_s0  ;;  %v2767_v15 = vpop.eup %2766 }
0x22e4   :  { %v2259_v13 = vadd.f32 1.0, %v2767_v15 }
0x22e6   :  { %2768 = vrcp.f32 %v2259_v13 }
0x22f3   :  { %v2769_v57 = vpop.eup %2768 }
0x22f4   :  { %v2266_v49 = vmul.f32 %v2769_v57, %v2162_v29 }
0x2355   :  { %v2269_v18 = vpop.permute.xlu1 %2268 }
0x2356   :  { %v2271_v36 = vmul.f32 %v2769_v57, %v2269_v18 }
0x2358   :  { %2273 = vrot.lane.b32.xlu0 %v2271_v36, %s2802_s0 }
0x23ca   :  { %v2274_v45 = vpop.permute.xlu0 %2273 }
0x23cb   :  { %v2276_v26 = vadd.f32 %v2274_v45, %v2266_v49 }
0x23cd   :  { %2770 = vtanh.f32 %v2276_v26 }
0x23ce   :  { %2772 = vpow2.f32 %v2517_v54 }
0x23da   :  { %v2771_v32 = vpop.eup %2770 }
0x23db   :  { %2279 = vrot.lane.b32.xlu1 %v2771_v32, %s2802_s0  ;;  %v2773_v58 = vpop.eup %2772 }
0x23dc   :  { %v2260_v60 = vadd.f32 1.0, %v2773_v58 }
0x23de   :  { %2774 = vrcp.f32 %v2260_v60 }
0x23eb   :  { %v2775_v3 = vpop.eup %2774 }
0x244d   :  { %v2280_v6 = vpop.permute.xlu1 %2279 }
0x244e   :  { %v2282_v22 = vmul.f32 %v2775_v3, %v2280_v6 }
0x2450   :  { %2283 = vst.msk [vmem:[#allocation4 + $0x38] sm:$0xff] %vm86_vm0, %v2282_v22 }
0x2451   :  { %2284 = vst.msk [vmem:[#allocation4] sm:$0xff] %vm370_vm3, %v2282_v22 }
0x2457   :  { %v2292_v2 = vld [vmem:[#allocation4 + $0x38] sm:$0xff] }
0x2458   :  { %v2285_v21 = vld [vmem:[#allocation4] sm:$0xff] }
0x2459   :  { %2559 = vmatprep.mubr.msk.f32.mxu0 %vm262_vm4, %v2285_v21 }
0x245a   :  { %2560 = vmatmul.mubr.msk.f32.vlgmr.msra.gmra.mxu0 %vm262_vm4, %v2286_v35 }
0x245b   :  { %2562 = vmatprep.mubr.msk.f32.mxu0 %vm262_vm4, %v2287_v42 }
0x245e   :  { %2563 = vmatmul.mubr.msk.f32.gmra.mxu0 %vm262_vm4, %v2288_v59 }
0x245f   :  { %2565 = vmatprep.mubr.msk.f32.mxu0 %vm262_vm4, %v2289_v53 }
0x2462   :  { %2566 = vmatmul.mubr.msk.f32.gmra.mxu0 %vm262_vm4, %v2290_v16 }
0x2463   :  { %2568 = vmatprep.mubr.msk.f32.mxu0 %vm262_vm4, %v2291_v47 }
0x2466   :  { %2569 = vmatmul.mubr.msk.f32.gmra.mxu0 %vm262_vm4, %v2292_v2 }
0x251a   :  { %v2561_v56 = vpop.f32.mrf.mxu0 }
0x251b   :  { %v2402_v24 = vadd.f32 %v2561_v56, %v2518_v27 }
0x251c   :  { %v2396_v30 = vpop.f32.mrf.mxu0 }
0x251d   :  { %v2436_v9 = vmax.f32 %v2402_v24, 0.0  ;;  %v2397_v8 = vadd.f32 %v2518_v27, %v2396_v30 }
0x251e   :  { %v2564_v44 = vpop.f32.mrf.mxu0 }
0x251f   :  { %2444 = vst.msk [vmem:[%s3735_s3 + $0x8] sm:$0xff] %vm86_vm0, %v2436_v9  ;;  %v2435_v43 = vmax.f32 %v2397_v8, 0.0  ;;  %v2412_v25 = vadd.f32 %v2564_v44, %v2518_v27 }
0x2520   :  { %v2406_v10 = vpop.f32.mrf.mxu0 }
0x2521   :  { %2443 = vst.msk [vmem:[%s3735_s3] sm:$0xff] %vm86_vm0, %v2435_v43  ;;  %v2438_v17 = vmax.f32 %v2412_v25, 0.0  ;;  %v2407_v23 = vadd.f32 %v2518_v27, %v2406_v10 }
0x2522   :  { %v2567_v51 = vpop.f32.mrf.mxu0 }
0x2523   :  { %2446 = vst.msk [vmem:[%s3735_s3 + $0x18] sm:$0xff] %vm86_vm0, %v2438_v17  ;;  %v2437_v48 = vmax.f32 %v2407_v23, 0.0  ;;  %v2422_v14 = vadd.f32 %v2567_v51, %v2518_v27 }
0x2524   :  { %v2416_v28 = vpop.f32.mrf.mxu0 }
0x2525   :  { %2445 = vst.msk [vmem:[%s3735_s3 + $0x10] sm:$0xff] %vm86_vm0, %v2437_v48  ;;  %v2440_v1 = vmax.f32 %v2422_v14, 0.0  ;;  %v2417_v37 = vadd.f32 %v2518_v27, %v2416_v28 }
0x2526   :  { %v2570_v29 = vpop.f32.mrf.mxu0 }
0x2527   :  { %2448 = vst.msk [vmem:[%s3735_s3 + $0x28] sm:$0xff] %vm86_vm0, %v2440_v1  ;;  %v2439_v38 = vmax.f32 %v2417_v37, 0.0  ;;  %v2432_v7 = vadd.f32 %v2570_v29, %v2518_v27 }
0x2528   :  { %v2426_v61 = vpop.f32.mrf.mxu0 }
0x2529   :  { %2447 = vst.msk [vmem:[%s3735_s3 + $0x20] sm:$0xff] %vm86_vm0, %v2439_v38  ;;  %v2442_v12 = vmax.f32 %v2432_v7, 0.0  ;;  %v2427_v63 = vadd.f32 %v2518_v27, %v2426_v61 }
0x252b   :  { %2450 = vst.msk [vmem:[%s3735_s3 + $0x38] sm:$0xff] %vm86_vm0, %v2442_v12  ;;  %v2441_v11 = vmax.f32 %v2427_v63, 0.0 }
0x252d   :  { %2449 = vst.msk [vmem:[%s3735_s3 + $0x30] sm:$0xff] %vm86_vm0, %v2441_v11 }
0x252e   :  { %2455 = vsyncpa [#allocation6], 1 }

</bundles_post_ra>
